<compile_context>
chip_gen: v7x
topology: tpu7x:2x2x1
jax: 0.10.0
libtpu: 0.0.40
codegen_flags: <defaults>
</compile_context>

<pallas_src>
import functools

import jax
import jax.numpy as jnp
from jax.experimental import pallas as pl
from jax.experimental.pallas import tpu as pltpu


def _round_up(x, m):
    return ((x + m - 1) // m) * m


def _choose_blocking(n):
    """(grid_steps, images_per_step).  Keep >=2 parallel steps on 2-TC parts."""
    try:
        kind = jax.devices()[0].device_kind.lower()
    except Exception:  # pragma: no cover - defensive
        kind = ""
    min_steps = 2 if ("v7" in kind and n >= 2) else 1
    best_b = 1
    for b in range(1, n + 1):
        if n % b == 0 and b <= 8 and (n // b) >= min_steps:
            best_b = b
    return n // best_b, best_b


def _projector_kernel(x_ref, w1_ref, w2_ref, mask_ref, o_ref,
                      patch1_ref, hbuf_ref, *, W, B, Csp, Ch, SOUT, SH):
    # x_ref    : (B, Csp, SX)      bf16  pre-padded input (1-lane left margin,
    #                                    flat padded grid, zero tail)
    # w1_ref   : (Ch, 9*Csp)       bf16  conv1 weights, k = tap*Csp + c
    # w2_ref   : (9, Ch, Ch)       bf16  conv2 per-tap (out, in) matrices
    # mask_ref : (1, B*SOUT)       f32   1 on interior pixels, 0 elsewhere
    # o_ref    : (B, Ch, SOUT)     f32   conv2 output, row-band layout
    # patch1_ref: VMEM (9*Csp, B*SOUT) bf16   conv1 im2col patches
    # hbuf_ref  : VMEM (Ch, B*SH)      bf16   hidden band (+ zero margins)
    Wp = W + 2
    BAND = 128                      # 128-aligned start of the band in a slab

    # ---- conv1: 9 static lane-shifted copies per image -> ONE MXU matmul ----
    for b in range(B):
        for tap in range(9):
            dy, dx = divmod(tap, 3)
            src = dy * Wp + dx                       # static, in [0, 2*Wp+2]
            patch1_ref[tap * Csp:(tap + 1) * Csp, b * SOUT:(b + 1) * SOUT] = (
                x_ref[b, :, src:src + SOUT])

    h = jnp.dot(w1_ref[...], patch1_ref[...],
                preferred_element_type=jnp.float32)          # (Ch, B*SOUT) f32

    # ReLU in f32; the mask zeroes left/right pad columns and the 128-pad tail
    # so the stored band doubles as conv2's zero padding.
    h = jnp.maximum(h, 0.0) * mask_ref[...]
    hbf = h.astype(hbuf_ref.dtype)

    tail = SH - BAND - SOUT
    zpre = jnp.zeros((Ch, BAND), hbuf_ref.dtype)
    ztail = jnp.zeros((Ch, tail), hbuf_ref.dtype)
    for b in range(B):
        # Pre-band zeros cover the top pad row read by conv2's dy=0 taps; tail
        # zeros keep the (discarded) overhang columns deterministic.  Cheap,
        # aligned (Ch,128) stores; done per step because scratch is per-core.
        hbuf_ref[:, b * SH:b * SH + BAND] = zpre
        hbuf_ref[:, b * SH + BAND + SOUT:(b + 1) * SH] = ztail
        hbuf_ref[:, b * SH + BAND:b * SH + BAND + SOUT] = (
            hbf[:, b * SOUT:(b + 1) * SOUT])

    # ---- conv2: no patch materialization.  9 accumulating (Ch,Ch)@(Ch,SOUT)
    # dots per image on lane-shifted hbuf views; f32 accumulator in vregs. ----
    for b in range(B):
        acc = jnp.zeros((Ch, SOUT), jnp.float32)
        for tap in range(9):
            dy, dx = divmod(tap, 3)
            src = b * SH + BAND + (dy - 1) * Wp + (dx - 1)   # static, >= 0
            acc = acc + jnp.dot(w2_ref[tap], hbuf_ref[:, src:src + SOUT],
                                preferred_element_type=jnp.float32)
        o_ref[b] = acc


def student_projector(fs_nchw, w1_oihw, w2_oihw):
    """fs_nchw: (N, Cs, H, W) float32. Weights in PyTorch OIHW layout."""
    N, Cs, H, W = fs_nchw.shape
    Ch = w1_oihw.shape[0]
    assert w1_oihw.shape == (Ch, Cs, 3, 3) and w2_oihw.shape == (Ch, Ch, 3, 3)
    assert Ch % 8 == 0, "hidden channels must be a sublane multiple"
    Hp, Wp = H + 2, W + 2
    assert Wp + 1 <= 128, "row-band layout assumes W <= 125"
    Ppad = Hp * Wp

    SOUT = _round_up(H * Wp, 128)                       # per-image output slab
    SX = _round_up(max(1 + Ppad, 2 * Wp + 2 + SOUT), 128)
    SH = _round_up(128 + Wp + 1 + SOUT, 128)
    Csp = _round_up(max(Cs, 16), 16)                    # bf16 sublane tile

    steps, B = _choose_blocking(N)

    # --- input glue: channel pad, 1-pixel spatial zero ring, flatten,
    # 1-lane left margin + zero tail per image.  Tiny & contiguous.
    x = fs_nchw.astype(jnp.bfloat16)
    x = jnp.pad(x, ((0, 0), (0, Csp - Cs), (1, 1), (1, 1)))   # (N,Csp,Hp,Wp)
    x = x.reshape(N, Csp, Ppad)
    x = jnp.pad(x, ((0, 0), (0, 0), (1, SX - 1 - Ppad)))      # (N,Csp,SX)

    # --- weights: conv1 -> (Ch, 9*Csp) im2col form; conv2 -> per-tap (O, I).
    w1 = jnp.transpose(w1_oihw, (0, 2, 3, 1))                 # (Ch,3,3,Cs)
    w1 = jnp.pad(w1, ((0, 0), (0, 0), (0, 0), (0, Csp - Cs)))
    w1 = w1.reshape(Ch, 9 * Csp).astype(jnp.bfloat16)
    w2 = jnp.transpose(w2_oihw, (2, 3, 0, 1)).reshape(9, Ch, Ch)
    w2 = w2.astype(jnp.bfloat16)

    # --- per-image band mask: 1 on interior pixels, 0 on pad cols + tail.
    q = jnp.arange(SOUT)
    col = q % Wp
    m = ((q < H * Wp) & (col >= 1) & (col <= W)).astype(jnp.float32)
    mask = jnp.tile(m, B).reshape(1, B * SOUT)

    kernel = functools.partial(_projector_kernel, W=W, B=B, Csp=Csp, Ch=Ch,
                               SOUT=SOUT, SH=SH)

    out_flat = pl.pallas_call(
        kernel,
        out_shape=jax.ShapeDtypeStruct((N, Ch, SOUT), jnp.float32),
        grid_spec=pltpu.PrefetchScalarGridSpec(
            num_scalar_prefetch=0,
            grid=(steps,),
            in_specs=[
                pl.BlockSpec((B, Csp, SX), lambda g: (g, 0, 0)),
                pl.BlockSpec((Ch, 9 * Csp), lambda g: (0, 0)),     # resident
                pl.BlockSpec((9, Ch, Ch), lambda g: (0, 0, 0)),    # resident
                pl.BlockSpec((1, B * SOUT), lambda g: (0, 0)),     # resident
            ],
            out_specs=pl.BlockSpec((B, Ch, SOUT), lambda g: (g, 0, 0)),
            scratch_shapes=[
                pltpu.VMEM((9 * Csp, B * SOUT), jnp.bfloat16),  # conv1 im2col
                pltpu.VMEM((Ch, B * SH), jnp.bfloat16),         # hidden band
            ],
        ),
        compiler_params=pltpu.CompilerParams(
            dimension_semantics=("parallel",),
            vmem_limit_bytes=32 * 1024 * 1024),
    )(x, w1, w2, mask)

    # Interior crop: the band is already NCHW-ordered -> (N, Ch, H, W).
    return out_flat[:, :, :H * Wp].reshape(N, Ch, H, Wp)[:, :, :, 1:W + 1]


def _reference(fs_nchw, w1_oihw, w2_oihw):
    """Pure-JAX reference (lax conv) for verification."""
    dn = ("NCHW", "OIHW", "NCHW")
    h = jax.lax.conv_general_dilated(fs_nchw, w1_oihw, (1, 1), "SAME",
                                     dimension_numbers=dn)
    h = jnp.maximum(h, 0.0)
    return jax.lax.conv_general_dilated(h, w2_oihw, (1, 1), "SAME",
                                        dimension_numbers=dn)


if __name__ == "__main__":
    # Small shapes consistent with the module: batch=2, channel_s=4,
    # channel_h=32, spatial 16x16.
    N, Cs, Ch, H, W = 2, 4, 32, 16, 16

    key = jax.random.PRNGKey(0)
    kx, k1, k2 = jax.random.split(key, 3)

    fs = jax.random.normal(kx, (N, Cs, H, W), dtype=jnp.float32)

    # Deterministic Kaiming-normal init (nonlinearity='relu'): std = sqrt(2/fan_in).
    std1 = (2.0 / (Cs * 3 * 3)) ** 0.5
    std2 = (2.0 / (Ch * 3 * 3)) ** 0.5
    w1 = jax.random.normal(k1, (Ch, Cs, 3, 3), dtype=jnp.float32) * std1
    w2 = jax.random.normal(k2, (Ch, Ch, 3, 3), dtype=jnp.float32) * std2

    out = jax.block_until_ready(student_projector(fs, w1, w2))
    assert out.shape == (N, Ch, H, W), out.shape

    # The kernel feeds the MXU bf16 operands with f32 accumulation, so compare
    # against the reference evaluated on the same bf16-rounded operands; the
    # only remaining difference is the bf16 round-trip of the hidden activation.
    rnd = lambda a: a.astype(jnp.bfloat16).astype(jnp.float32)
    ref = _reference(rnd(fs), rnd(w1), rnd(w2))
    err = float(jnp.max(jnp.abs(out - ref)))
    assert err < 5e-2, err

    print("KERNEL_OK")
</pallas_src>

<mosaic_0001>
module attributes {stable_mosaic.version = 11 : i64} {
  func.func @_projector_kernel(%arg0: i32, %arg1: memref<2x16x512xbf16, #tpu.memory_space<vmem>>, %arg2: memref<32x144xbf16, #tpu.memory_space<vmem>>, %arg3: memref<9x32x32xbf16, #tpu.memory_space<vmem>>, %arg4: memref<1x768xf32, #tpu.memory_space<vmem>>, %arg5: memref<2x32x384xf32, #tpu.memory_space<vmem>>, %arg6: memref<144x768xbf16, #tpu.memory_space<vmem>>, %arg7: memref<32x1280xbf16, #tpu.memory_space<vmem>>) attributes {dimension_semantics = [#tpu.dimension_semantics<parallel>], iteration_bounds = array<i64: 1>, scalar_prefetch = 0 : i64, scratch_operands = 2 : i64, tpu.core_type = #tpu.core_type<tc>, window_params = [{transform_indices = @transform_0, window_bounds = array<i64: 2, 16, 512>}, {pipeline_mode = #tpu.pipeline_mode<synchronous>, transform_indices = @transform_1, window_bounds = array<i64: 32, 144>}, {pipeline_mode = #tpu.pipeline_mode<synchronous>, transform_indices = @transform_2, window_bounds = array<i64: 9, 32, 32>}, {pipeline_mode = #tpu.pipeline_mode<synchronous>, transform_indices = @transform_3, window_bounds = array<i64: 1, 768>}, {transform_indices = @transform_4, window_bounds = array<i64: 2, 32, 384>}]} {
    %c0 = arith.constant 0 : index
    %c0_0 = arith.constant 0 : index
    %c0_1 = arith.constant 0 : index
    %0 = vector.load %arg1[%c0, %c0_0, %c0_1] : memref<2x16x512xbf16, #tpu.memory_space<vmem>>, vector<1x16x384xbf16>
    %1 = vector.shape_cast %0 : vector<1x16x384xbf16> to vector<16x384xbf16>
    %c0_2 = arith.constant 0 : index
    %c0_3 = arith.constant 0 : index
    %2 = vector.load %arg6[%c0_2, %c0_3] : memref<144x768xbf16, #tpu.memory_space<vmem>>, vector<16x384xbf16>
    tpu.vector_store %arg6[%c0_2, %c0_3], %1 {strides = array<i32>} : memref<144x768xbf16, #tpu.memory_space<vmem>>, vector<16x384xbf16>,
    %c0_4 = arith.constant 0 : index
    %c0_5 = arith.constant 0 : index
    %c1 = arith.constant 1 : index
    %3 = vector.load %arg1[%c0_4, %c0_5, %c1] : memref<2x16x512xbf16, #tpu.memory_space<vmem>>, vector<1x16x384xbf16>
    %4 = vector.shape_cast %3 : vector<1x16x384xbf16> to vector<16x384xbf16>
    %c16 = arith.constant 16 : index
    %c0_6 = arith.constant 0 : index
    %5 = vector.load %arg6[%c16, %c0_6] : memref<144x768xbf16, #tpu.memory_space<vmem>>, vector<16x384xbf16>
    tpu.vector_store %arg6[%c16, %c0_6], %4 {strides = array<i32>} : memref<144x768xbf16, #tpu.memory_space<vmem>>, vector<16x384xbf16>,
    %c0_7 = arith.constant 0 : index
    %c0_8 = arith.constant 0 : index
    %c2 = arith.constant 2 : index
    %6 = vector.load %arg1[%c0_7, %c0_8, %c2] : memref<2x16x512xbf16, #tpu.memory_space<vmem>>, vector<1x16x384xbf16>
    %7 = vector.shape_cast %6 : vector<1x16x384xbf16> to vector<16x384xbf16>
    %c32 = arith.constant 32 : index
    %c0_9 = arith.constant 0 : index
    %8 = vector.load %arg6[%c32, %c0_9] : memref<144x768xbf16, #tpu.memory_space<vmem>>, vector<16x384xbf16>
    tpu.vector_store %arg6[%c32, %c0_9], %7 {strides = array<i32>} : memref<144x768xbf16, #tpu.memory_space<vmem>>, vector<16x384xbf16>,
    %c0_10 = arith.constant 0 : index
    %c0_11 = arith.constant 0 : index
    %c18 = arith.constant 18 : index
    %9 = vector.load %arg1[%c0_10, %c0_11, %c18] : memref<2x16x512xbf16, #tpu.memory_space<vmem>>, vector<1x16x384xbf16>
    %10 = vector.shape_cast %9 : vector<1x16x384xbf16> to vector<16x384xbf16>
    %c48 = arith.constant 48 : index
    %c0_12 = arith.constant 0 : index
    %11 = vector.load %arg6[%c48, %c0_12] : memref<144x768xbf16, #tpu.memory_space<vmem>>, vector<16x384xbf16>
    tpu.vector_store %arg6[%c48, %c0_12], %10 {strides = array<i32>} : memref<144x768xbf16, #tpu.memory_space<vmem>>, vector<16x384xbf16>,
    %c0_13 = arith.constant 0 : index
    %c0_14 = arith.constant 0 : index
    %c19 = arith.constant 19 : index
    %12 = vector.load %arg1[%c0_13, %c0_14, %c19] : memref<2x16x512xbf16, #tpu.memory_space<vmem>>, vector<1x16x384xbf16>
    %13 = vector.shape_cast %12 : vector<1x16x384xbf16> to vector<16x384xbf16>
    %c64 = arith.constant 64 : index
    %c0_15 = arith.constant 0 : index
    %14 = vector.load %arg6[%c64, %c0_15] : memref<144x768xbf16, #tpu.memory_space<vmem>>, vector<16x384xbf16>
    tpu.vector_store %arg6[%c64, %c0_15], %13 {strides = array<i32>} : memref<144x768xbf16, #tpu.memory_space<vmem>>, vector<16x384xbf16>,
    %c0_16 = arith.constant 0 : index
    %c0_17 = arith.constant 0 : index
    %c20 = arith.constant 20 : index
    %15 = vector.load %arg1[%c0_16, %c0_17, %c20] : memref<2x16x512xbf16, #tpu.memory_space<vmem>>, vector<1x16x384xbf16>
    %16 = vector.shape_cast %15 : vector<1x16x384xbf16> to vector<16x384xbf16>
    %c80 = arith.constant 80 : index
    %c0_18 = arith.constant 0 : index
    %17 = vector.load %arg6[%c80, %c0_18] : memref<144x768xbf16, #tpu.memory_space<vmem>>, vector<16x384xbf16>
    tpu.vector_store %arg6[%c80, %c0_18], %16 {strides = array<i32>} : memref<144x768xbf16, #tpu.memory_space<vmem>>, vector<16x384xbf16>,
    %c0_19 = arith.constant 0 : index
    %c0_20 = arith.constant 0 : index
    %c36 = arith.constant 36 : index
    %18 = vector.load %arg1[%c0_19, %c0_20, %c36] : memref<2x16x512xbf16, #tpu.memory_space<vmem>>, vector<1x16x384xbf16>
    %19 = vector.shape_cast %18 : vector<1x16x384xbf16> to vector<16x384xbf16>
    %c96 = arith.constant 96 : index
    %c0_21 = arith.constant 0 : index
    %20 = vector.load %arg6[%c96, %c0_21] : memref<144x768xbf16, #tpu.memory_space<vmem>>, vector<16x384xbf16>
    tpu.vector_store %arg6[%c96, %c0_21], %19 {strides = array<i32>} : memref<144x768xbf16, #tpu.memory_space<vmem>>, vector<16x384xbf16>,
    %c0_22 = arith.constant 0 : index
    %c0_23 = arith.constant 0 : index
    %c37 = arith.constant 37 : index
    %21 = vector.load %arg1[%c0_22, %c0_23, %c37] : memref<2x16x512xbf16, #tpu.memory_space<vmem>>, vector<1x16x384xbf16>
    %22 = vector.shape_cast %21 : vector<1x16x384xbf16> to vector<16x384xbf16>
    %c112 = arith.constant 112 : index
    %c0_24 = arith.constant 0 : index
    %23 = vector.load %arg6[%c112, %c0_24] : memref<144x768xbf16, #tpu.memory_space<vmem>>, vector<16x384xbf16>
    tpu.vector_store %arg6[%c112, %c0_24], %22 {strides = array<i32>} : memref<144x768xbf16, #tpu.memory_space<vmem>>, vector<16x384xbf16>,
    %c0_25 = arith.constant 0 : index
    %c0_26 = arith.constant 0 : index
    %c38 = arith.constant 38 : index
    %24 = vector.load %arg1[%c0_25, %c0_26, %c38] : memref<2x16x512xbf16, #tpu.memory_space<vmem>>, vector<1x16x384xbf16>
    %25 = vector.shape_cast %24 : vector<1x16x384xbf16> to vector<16x384xbf16>
    %c128 = arith.constant 128 : index
    %c0_27 = arith.constant 0 : index
    %26 = vector.load %arg6[%c128, %c0_27] : memref<144x768xbf16, #tpu.memory_space<vmem>>, vector<16x384xbf16>
    tpu.vector_store %arg6[%c128, %c0_27], %25 {strides = array<i32>} : memref<144x768xbf16, #tpu.memory_space<vmem>>, vector<16x384xbf16>,
    %c1_28 = arith.constant 1 : index
    %c0_29 = arith.constant 0 : index
    %c0_30 = arith.constant 0 : index
    %27 = vector.load %arg1[%c1_28, %c0_29, %c0_30] : memref<2x16x512xbf16, #tpu.memory_space<vmem>>, vector<1x16x384xbf16>
    %28 = vector.shape_cast %27 : vector<1x16x384xbf16> to vector<16x384xbf16>
    %c0_31 = arith.constant 0 : index
    %c384 = arith.constant 384 : index
    %29 = vector.load %arg6[%c0_31, %c384] : memref<144x768xbf16, #tpu.memory_space<vmem>>, vector<16x384xbf16>
    tpu.vector_store %arg6[%c0_31, %c384], %28 {strides = array<i32>} : memref<144x768xbf16, #tpu.memory_space<vmem>>, vector<16x384xbf16>,
    %c1_32 = arith.constant 1 : index
    %c0_33 = arith.constant 0 : index
    %c1_34 = arith.constant 1 : index
    %30 = vector.load %arg1[%c1_32, %c0_33, %c1_34] : memref<2x16x512xbf16, #tpu.memory_space<vmem>>, vector<1x16x384xbf16>
    %31 = vector.shape_cast %30 : vector<1x16x384xbf16> to vector<16x384xbf16>
    %c16_35 = arith.constant 16 : index
    %c384_36 = arith.constant 384 : index
    %32 = vector.load %arg6[%c16_35, %c384_36] : memref<144x768xbf16, #tpu.memory_space<vmem>>, vector<16x384xbf16>
    tpu.vector_store %arg6[%c16_35, %c384_36], %31 {strides = array<i32>} : memref<144x768xbf16, #tpu.memory_space<vmem>>, vector<16x384xbf16>,
    %c1_37 = arith.constant 1 : index
    %c0_38 = arith.constant 0 : index
    %c2_39 = arith.constant 2 : index
    %33 = vector.load %arg1[%c1_37, %c0_38, %c2_39] : memref<2x16x512xbf16, #tpu.memory_space<vmem>>, vector<1x16x384xbf16>
    %34 = vector.shape_cast %33 : vector<1x16x384xbf16> to vector<16x384xbf16>
    %c32_40 = arith.constant 32 : index
    %c384_41 = arith.constant 384 : index
    %35 = vector.load %arg6[%c32_40, %c384_41] : memref<144x768xbf16, #tpu.memory_space<vmem>>, vector<16x384xbf16>
    tpu.vector_store %arg6[%c32_40, %c384_41], %34 {strides = array<i32>} : memref<144x768xbf16, #tpu.memory_space<vmem>>, vector<16x384xbf16>,
    %c1_42 = arith.constant 1 : index
    %c0_43 = arith.constant 0 : index
    %c18_44 = arith.constant 18 : index
    %36 = vector.load %arg1[%c1_42, %c0_43, %c18_44] : memref<2x16x512xbf16, #tpu.memory_space<vmem>>, vector<1x16x384xbf16>
    %37 = vector.shape_cast %36 : vector<1x16x384xbf16> to vector<16x384xbf16>
    %c48_45 = arith.constant 48 : index
    %c384_46 = arith.constant 384 : index
    %38 = vector.load %arg6[%c48_45, %c384_46] : memref<144x768xbf16, #tpu.memory_space<vmem>>, vector<16x384xbf16>
    tpu.vector_store %arg6[%c48_45, %c384_46], %37 {strides = array<i32>} : memref<144x768xbf16, #tpu.memory_space<vmem>>, vector<16x384xbf16>,
    %c1_47 = arith.constant 1 : index
    %c0_48 = arith.constant 0 : index
    %c19_49 = arith.constant 19 : index
    %39 = vector.load %arg1[%c1_47, %c0_48, %c19_49] : memref<2x16x512xbf16, #tpu.memory_space<vmem>>, vector<1x16x384xbf16>
    %40 = vector.shape_cast %39 : vector<1x16x384xbf16> to vector<16x384xbf16>
    %c64_50 = arith.constant 64 : index
    %c384_51 = arith.constant 384 : index
    %41 = vector.load %arg6[%c64_50, %c384_51] : memref<144x768xbf16, #tpu.memory_space<vmem>>, vector<16x384xbf16>
    tpu.vector_store %arg6[%c64_50, %c384_51], %40 {strides = array<i32>} : memref<144x768xbf16, #tpu.memory_space<vmem>>, vector<16x384xbf16>,
    %c1_52 = arith.constant 1 : index
    %c0_53 = arith.constant 0 : index
    %c20_54 = arith.constant 20 : index
    %42 = vector.load %arg1[%c1_52, %c0_53, %c20_54] : memref<2x16x512xbf16, #tpu.memory_space<vmem>>, vector<1x16x384xbf16>
    %43 = vector.shape_cast %42 : vector<1x16x384xbf16> to vector<16x384xbf16>
    %c80_55 = arith.constant 80 : index
    %c384_56 = arith.constant 384 : index
    %44 = vector.load %arg6[%c80_55, %c384_56] : memref<144x768xbf16, #tpu.memory_space<vmem>>, vector<16x384xbf16>
    tpu.vector_store %arg6[%c80_55, %c384_56], %43 {strides = array<i32>} : memref<144x768xbf16, #tpu.memory_space<vmem>>, vector<16x384xbf16>,
    %c1_57 = arith.constant 1 : index
    %c0_58 = arith.constant 0 : index
    %c36_59 = arith.constant 36 : index
    %45 = vector.load %arg1[%c1_57, %c0_58, %c36_59] : memref<2x16x512xbf16, #tpu.memory_space<vmem>>, vector<1x16x384xbf16>
    %46 = vector.shape_cast %45 : vector<1x16x384xbf16> to vector<16x384xbf16>
    %c96_60 = arith.constant 96 : index
    %c384_61 = arith.constant 384 : index
    %47 = vector.load %arg6[%c96_60, %c384_61] : memref<144x768xbf16, #tpu.memory_space<vmem>>, vector<16x384xbf16>
    tpu.vector_store %arg6[%c96_60, %c384_61], %46 {strides = array<i32>} : memref<144x768xbf16, #tpu.memory_space<vmem>>, vector<16x384xbf16>,
    %c1_62 = arith.constant 1 : index
    %c0_63 = arith.constant 0 : index
    %c37_64 = arith.constant 37 : index
    %48 = vector.load %arg1[%c1_62, %c0_63, %c37_64] : memref<2x16x512xbf16, #tpu.memory_space<vmem>>, vector<1x16x384xbf16>
    %49 = vector.shape_cast %48 : vector<1x16x384xbf16> to vector<16x384xbf16>
    %c112_65 = arith.constant 112 : index
    %c384_66 = arith.constant 384 : index
    %50 = vector.load %arg6[%c112_65, %c384_66] : memref<144x768xbf16, #tpu.memory_space<vmem>>, vector<16x384xbf16>
    tpu.vector_store %arg6[%c112_65, %c384_66], %49 {strides = array<i32>} : memref<144x768xbf16, #tpu.memory_space<vmem>>, vector<16x384xbf16>,
    %c1_67 = arith.constant 1 : index
    %c0_68 = arith.constant 0 : index
    %c38_69 = arith.constant 38 : index
    %51 = vector.load %arg1[%c1_67, %c0_68, %c38_69] : memref<2x16x512xbf16, #tpu.memory_space<vmem>>, vector<1x16x384xbf16>
    %52 = vector.shape_cast %51 : vector<1x16x384xbf16> to vector<16x384xbf16>
    %c128_70 = arith.constant 128 : index
    %c384_71 = arith.constant 384 : index
    %53 = vector.load %arg6[%c128_70, %c384_71] : memref<144x768xbf16, #tpu.memory_space<vmem>>, vector<16x384xbf16>
    tpu.vector_store %arg6[%c128_70, %c384_71], %52 {strides = array<i32>} : memref<144x768xbf16, #tpu.memory_space<vmem>>, vector<16x384xbf16>,
    %c0_72 = arith.constant 0 : index
    %c0_73 = arith.constant 0 : index
    %54 = vector.load %arg2[%c0_72, %c0_73] : memref<32x144xbf16, #tpu.memory_space<vmem>>, vector<32x144xbf16>
    %c0_74 = arith.constant 0 : index
    %c0_75 = arith.constant 0 : index
    %55 = vector.load %arg6[%c0_74, %c0_75] : memref<144x768xbf16, #tpu.memory_space<vmem>>, vector<144x768xbf16>
    %cst = arith.constant dense<0.000000e+00> : vector<32x768xf32>
    %56 = tpu.matmul %54, %55, %cst {dimension_numbers = #tpu.dot_dimension_numbers<[1], [0], [0], [1], [0, 0, 1, 1], [], []>} : vector<32x144xbf16>, vector<144x768xbf16>, vector<32x768xf32> -> vector<32x768xf32>
    %cst_76 = arith.constant 0.000000e+00 : f32
    %57 = vector.broadcast %cst_76 : f32 to vector<32x768xf32>
    %58 = arith.maximumf %56, %57 : vector<32x768xf32>
    %c0_77 = arith.constant 0 : index
    %c0_78 = arith.constant 0 : index
    %59 = vector.load %arg4[%c0_77, %c0_78] : memref<1x768xf32, #tpu.memory_space<vmem>>, vector<1x768xf32>
    %60 = vector.broadcast %59 : vector<1x768xf32> to vector<32x768xf32>
    %61 = arith.mulf %58, %60 : vector<32x768xf32>
    %62 = arith.truncf %61 : vector<32x768xf32> to vector<32x768xbf16>
    %cst_79 = arith.constant 0.000000e+00 : bf16
    %63 = vector.broadcast %cst_79 : bf16 to vector<32x128xbf16>
    %cst_80 = arith.constant 0.000000e+00 : bf16
    %64 = vector.broadcast %cst_80 : bf16 to vector<32x128xbf16>
    %c0_81 = arith.constant 0 : index
    %c0_82 = arith.constant 0 : index
    %65 = vector.load %arg7[%c0_81, %c0_82] : memref<32x1280xbf16, #tpu.memory_space<vmem>>, vector<32x128xbf16>
    tpu.vector_store %arg7[%c0_81, %c0_82], %63 {strides = array<i32>} : memref<32x1280xbf16, #tpu.memory_space<vmem>>, vector<32x128xbf16>,
    %c0_83 = arith.constant 0 : index
    %c512 = arith.constant 512 : index
    %66 = vector.load %arg7[%c0_83, %c512] : memref<32x1280xbf16, #tpu.memory_space<vmem>>, vector<32x128xbf16>
    tpu.vector_store %arg7[%c0_83, %c512], %64 {strides = array<i32>} : memref<32x1280xbf16, #tpu.memory_space<vmem>>, vector<32x128xbf16>,
    %67 = vector.extract_strided_slice %62 {offsets = [0, 0], sizes = [32, 384], strides = [1, 1]} : vector<32x768xbf16> to vector<32x384xbf16>
    %c0_84 = arith.constant 0 : index
    %c128_85 = arith.constant 128 : index
    %68 = vector.load %arg7[%c0_84, %c128_85] : memref<32x1280xbf16, #tpu.memory_space<vmem>>, vector<32x384xbf16>
    tpu.vector_store %arg7[%c0_84, %c128_85], %67 {strides = array<i32>} : memref<32x1280xbf16, #tpu.memory_space<vmem>>, vector<32x384xbf16>,
    %c0_86 = arith.constant 0 : index
    %c640 = arith.constant 640 : index
    %69 = vector.load %arg7[%c0_86, %c640] : memref<32x1280xbf16, #tpu.memory_space<vmem>>, vector<32x128xbf16>
    tpu.vector_store %arg7[%c0_86, %c640], %63 {strides = array<i32>} : memref<32x1280xbf16, #tpu.memory_space<vmem>>, vector<32x128xbf16>,
    %c0_87 = arith.constant 0 : index
    %c1152 = arith.constant 1152 : index
    %70 = vector.load %arg7[%c0_87, %c1152] : memref<32x1280xbf16, #tpu.memory_space<vmem>>, vector<32x128xbf16>
    tpu.vector_store %arg7[%c0_87, %c1152], %64 {strides = array<i32>} : memref<32x1280xbf16, #tpu.memory_space<vmem>>, vector<32x128xbf16>,
    %71 = vector.extract_strided_slice %62 {offsets = [0, 384], sizes = [32, 384], strides = [1, 1]} : vector<32x768xbf16> to vector<32x384xbf16>
    %c0_88 = arith.constant 0 : index
    %c768 = arith.constant 768 : index
    %72 = vector.load %arg7[%c0_88, %c768] : memref<32x1280xbf16, #tpu.memory_space<vmem>>, vector<32x384xbf16>
    tpu.vector_store %arg7[%c0_88, %c768], %71 {strides = array<i32>} : memref<32x1280xbf16, #tpu.memory_space<vmem>>, vector<32x384xbf16>,
    %cst_89 = arith.constant 0.000000e+00 : f32
    %73 = vector.broadcast %cst_89 : f32 to vector<32x384xf32>
    %c0_90 = arith.constant 0 : index
    %c0_91 = arith.constant 0 : index
    %c0_92 = arith.constant 0 : index
    %74 = vector.load %arg3[%c0_90, %c0_91, %c0_92] : memref<9x32x32xbf16, #tpu.memory_space<vmem>>, vector<1x32x32xbf16>
    %75 = vector.shape_cast %74 : vector<1x32x32xbf16> to vector<32x32xbf16>
    %c0_93 = arith.constant 0 : index
    %c109 = arith.constant 109 : index
    %76 = vector.load %arg7[%c0_93, %c109] : memref<32x1280xbf16, #tpu.memory_space<vmem>>, vector<32x384xbf16>
    %cst_94 = arith.constant dense<0.000000e+00> : vector<32x384xf32>
    %77 = tpu.matmul %75, %76, %cst_94 {dimension_numbers = #tpu.dot_dimension_numbers<[1], [0], [0], [1], [0, 0, 1, 1], [], []>} : vector<32x32xbf16>, vector<32x384xbf16>, vector<32x384xf32> -> vector<32x384xf32>
    %78 = arith.addf %73, %77 : vector<32x384xf32>
    %c1_95 = arith.constant 1 : index
    %c0_96 = arith.constant 0 : index
    %c0_97 = arith.constant 0 : index
    %79 = vector.load %arg3[%c1_95, %c0_96, %c0_97] : memref<9x32x32xbf16, #tpu.memory_space<vmem>>, vector<1x32x32xbf16>
    %80 = vector.shape_cast %79 : vector<1x32x32xbf16> to vector<32x32xbf16>
    %c0_98 = arith.constant 0 : index
    %c110 = arith.constant 110 : index
    %81 = vector.load %arg7[%c0_98, %c110] : memref<32x1280xbf16, #tpu.memory_space<vmem>>, vector<32x384xbf16>
    %cst_99 = arith.constant dense<0.000000e+00> : vector<32x384xf32>
    %82 = tpu.matmul %80, %81, %cst_99 {dimension_numbers = #tpu.dot_dimension_numbers<[1], [0], [0], [1], [0, 0, 1, 1], [], []>} : vector<32x32xbf16>, vector<32x384xbf16>, vector<32x384xf32> -> vector<32x384xf32>
    %83 = arith.addf %78, %82 : vector<32x384xf32>
    %c2_100 = arith.constant 2 : index
    %c0_101 = arith.constant 0 : index
    %c0_102 = arith.constant 0 : index
    %84 = vector.load %arg3[%c2_100, %c0_101, %c0_102] : memref<9x32x32xbf16, #tpu.memory_space<vmem>>, vector<1x32x32xbf16>
    %85 = vector.shape_cast %84 : vector<1x32x32xbf16> to vector<32x32xbf16>
    %c0_103 = arith.constant 0 : index
    %c111 = arith.constant 111 : index
    %86 = vector.load %arg7[%c0_103, %c111] : memref<32x1280xbf16, #tpu.memory_space<vmem>>, vector<32x384xbf16>
    %cst_104 = arith.constant dense<0.000000e+00> : vector<32x384xf32>
    %87 = tpu.matmul %85, %86, %cst_104 {dimension_numbers = #tpu.dot_dimension_numbers<[1], [0], [0], [1], [0, 0, 1, 1], [], []>} : vector<32x32xbf16>, vector<32x384xbf16>, vector<32x384xf32> -> vector<32x384xf32>
    %88 = arith.addf %83, %87 : vector<32x384xf32>
    %c3 = arith.constant 3 : index
    %c0_105 = arith.constant 0 : index
    %c0_106 = arith.constant 0 : index
    %89 = vector.load %arg3[%c3, %c0_105, %c0_106] : memref<9x32x32xbf16, #tpu.memory_space<vmem>>, vector<1x32x32xbf16>
    %90 = vector.shape_cast %89 : vector<1x32x32xbf16> to vector<32x32xbf16>
    %c0_107 = arith.constant 0 : index
    %c127 = arith.constant 127 : index
    %91 = vector.load %arg7[%c0_107, %c127] : memref<32x1280xbf16, #tpu.memory_space<vmem>>, vector<32x384xbf16>
    %cst_108 = arith.constant dense<0.000000e+00> : vector<32x384xf32>
    %92 = tpu.matmul %90, %91, %cst_108 {dimension_numbers = #tpu.dot_dimension_numbers<[1], [0], [0], [1], [0, 0, 1, 1], [], []>} : vector<32x32xbf16>, vector<32x384xbf16>, vector<32x384xf32> -> vector<32x384xf32>
    %93 = arith.addf %88, %92 : vector<32x384xf32>
    %c4 = arith.constant 4 : index
    %c0_109 = arith.constant 0 : index
    %c0_110 = arith.constant 0 : index
    %94 = vector.load %arg3[%c4, %c0_109, %c0_110] : memref<9x32x32xbf16, #tpu.memory_space<vmem>>, vector<1x32x32xbf16>
    %95 = vector.shape_cast %94 : vector<1x32x32xbf16> to vector<32x32xbf16>
    %c0_111 = arith.constant 0 : index
    %c128_112 = arith.constant 128 : index
    %96 = vector.load %arg7[%c0_111, %c128_112] : memref<32x1280xbf16, #tpu.memory_space<vmem>>, vector<32x384xbf16>
    %cst_113 = arith.constant dense<0.000000e+00> : vector<32x384xf32>
    %97 = tpu.matmul %95, %96, %cst_113 {dimension_numbers = #tpu.dot_dimension_numbers<[1], [0], [0], [1], [0, 0, 1, 1], [], []>} : vector<32x32xbf16>, vector<32x384xbf16>, vector<32x384xf32> -> vector<32x384xf32>
    %98 = arith.addf %93, %97 : vector<32x384xf32>
    %c5 = arith.constant 5 : index
    %c0_114 = arith.constant 0 : index
    %c0_115 = arith.constant 0 : index
    %99 = vector.load %arg3[%c5, %c0_114, %c0_115] : memref<9x32x32xbf16, #tpu.memory_space<vmem>>, vector<1x32x32xbf16>
    %100 = vector.shape_cast %99 : vector<1x32x32xbf16> to vector<32x32xbf16>
    %c0_116 = arith.constant 0 : index
    %c129 = arith.constant 129 : index
    %101 = vector.load %arg7[%c0_116, %c129] : memref<32x1280xbf16, #tpu.memory_space<vmem>>, vector<32x384xbf16>
    %cst_117 = arith.constant dense<0.000000e+00> : vector<32x384xf32>
    %102 = tpu.matmul %100, %101, %cst_117 {dimension_numbers = #tpu.dot_dimension_numbers<[1], [0], [0], [1], [0, 0, 1, 1], [], []>} : vector<32x32xbf16>, vector<32x384xbf16>, vector<32x384xf32> -> vector<32x384xf32>
    %103 = arith.addf %98, %102 : vector<32x384xf32>
    %c6 = arith.constant 6 : index
    %c0_118 = arith.constant 0 : index
    %c0_119 = arith.constant 0 : index
    %104 = vector.load %arg3[%c6, %c0_118, %c0_119] : memref<9x32x32xbf16, #tpu.memory_space<vmem>>, vector<1x32x32xbf16>
    %105 = vector.shape_cast %104 : vector<1x32x32xbf16> to vector<32x32xbf16>
    %c0_120 = arith.constant 0 : index
    %c145 = arith.constant 145 : index
    %106 = vector.load %arg7[%c0_120, %c145] : memref<32x1280xbf16, #tpu.memory_space<vmem>>, vector<32x384xbf16>
    %cst_121 = arith.constant dense<0.000000e+00> : vector<32x384xf32>
    %107 = tpu.matmul %105, %106, %cst_121 {dimension_numbers = #tpu.dot_dimension_numbers<[1], [0], [0], [1], [0, 0, 1, 1], [], []>} : vector<32x32xbf16>, vector<32x384xbf16>, vector<32x384xf32> -> vector<32x384xf32>
    %108 = arith.addf %103, %107 : vector<32x384xf32>
    %c7 = arith.constant 7 : index
    %c0_122 = arith.constant 0 : index
    %c0_123 = arith.constant 0 : index
    %109 = vector.load %arg3[%c7, %c0_122, %c0_123] : memref<9x32x32xbf16, #tpu.memory_space<vmem>>, vector<1x32x32xbf16>
    %110 = vector.shape_cast %109 : vector<1x32x32xbf16> to vector<32x32xbf16>
    %c0_124 = arith.constant 0 : index
    %c146 = arith.constant 146 : index
    %111 = vector.load %arg7[%c0_124, %c146] : memref<32x1280xbf16, #tpu.memory_space<vmem>>, vector<32x384xbf16>
    %cst_125 = arith.constant dense<0.000000e+00> : vector<32x384xf32>
    %112 = tpu.matmul %110, %111, %cst_125 {dimension_numbers = #tpu.dot_dimension_numbers<[1], [0], [0], [1], [0, 0, 1, 1], [], []>} : vector<32x32xbf16>, vector<32x384xbf16>, vector<32x384xf32> -> vector<32x384xf32>
    %113 = arith.addf %108, %112 : vector<32x384xf32>
    %c8 = arith.constant 8 : index
    %c0_126 = arith.constant 0 : index
    %c0_127 = arith.constant 0 : index
    %114 = vector.load %arg3[%c8, %c0_126, %c0_127] : memref<9x32x32xbf16, #tpu.memory_space<vmem>>, vector<1x32x32xbf16>
    %115 = vector.shape_cast %114 : vector<1x32x32xbf16> to vector<32x32xbf16>
    %c0_128 = arith.constant 0 : index
    %c147 = arith.constant 147 : index
    %116 = vector.load %arg7[%c0_128, %c147] : memref<32x1280xbf16, #tpu.memory_space<vmem>>, vector<32x384xbf16>
    %cst_129 = arith.constant dense<0.000000e+00> : vector<32x384xf32>
    %117 = tpu.matmul %115, %116, %cst_129 {dimension_numbers = #tpu.dot_dimension_numbers<[1], [0], [0], [1], [0, 0, 1, 1], [], []>} : vector<32x32xbf16>, vector<32x384xbf16>, vector<32x384xf32> -> vector<32x384xf32>
    %118 = arith.addf %113, %117 : vector<32x384xf32>
    %c0_130 = arith.constant 0 : index
    %c0_131 = arith.constant 0 : index
    %c0_132 = arith.constant 0 : index
    %119 = vector.load %arg5[%c0_130, %c0_131, %c0_132] : memref<2x32x384xf32, #tpu.memory_space<vmem>>, vector<1x32x384xf32>
    %120 = vector.shape_cast %119 : vector<1x32x384xf32> to vector<32x384xf32>
    %121 = vector.shape_cast %118 : vector<32x384xf32> to vector<1x32x384xf32>
    tpu.vector_store %arg5[%c0_130, %c0_131, %c0_132], %121 {strides = array<i32>} : memref<2x32x384xf32, #tpu.memory_space<vmem>>, vector<1x32x384xf32>,
    %cst_133 = arith.constant 0.000000e+00 : f32
    %122 = vector.broadcast %cst_133 : f32 to vector<32x384xf32>
    %c0_134 = arith.constant 0 : index
    %c0_135 = arith.constant 0 : index
    %c0_136 = arith.constant 0 : index
    %123 = vector.load %arg3[%c0_134, %c0_135, %c0_136] : memref<9x32x32xbf16, #tpu.memory_space<vmem>>, vector<1x32x32xbf16>
    %124 = vector.shape_cast %123 : vector<1x32x32xbf16> to vector<32x32xbf16>
    %c0_137 = arith.constant 0 : index
    %c749 = arith.constant 749 : index
    %125 = vector.load %arg7[%c0_137, %c749] : memref<32x1280xbf16, #tpu.memory_space<vmem>>, vector<32x384xbf16>
    %cst_138 = arith.constant dense<0.000000e+00> : vector<32x384xf32>
    %126 = tpu.matmul %124, %125, %cst_138 {dimension_numbers = #tpu.dot_dimension_numbers<[1], [0], [0], [1], [0, 0, 1, 1], [], []>} : vector<32x32xbf16>, vector<32x384xbf16>, vector<32x384xf32> -> vector<32x384xf32>
    %127 = arith.addf %122, %126 : vector<32x384xf32>
    %c1_139 = arith.constant 1 : index
    %c0_140 = arith.constant 0 : index
    %c0_141 = arith.constant 0 : index
    %128 = vector.load %arg3[%c1_139, %c0_140, %c0_141] : memref<9x32x32xbf16, #tpu.memory_space<vmem>>, vector<1x32x32xbf16>
    %129 = vector.shape_cast %128 : vector<1x32x32xbf16> to vector<32x32xbf16>
    %c0_142 = arith.constant 0 : index
    %c750 = arith.constant 750 : index
    %130 = vector.load %arg7[%c0_142, %c750] : memref<32x1280xbf16, #tpu.memory_space<vmem>>, vector<32x384xbf16>
    %cst_143 = arith.constant dense<0.000000e+00> : vector<32x384xf32>
    %131 = tpu.matmul %129, %130, %cst_143 {dimension_numbers = #tpu.dot_dimension_numbers<[1], [0], [0], [1], [0, 0, 1, 1], [], []>} : vector<32x32xbf16>, vector<32x384xbf16>, vector<32x384xf32> -> vector<32x384xf32>
    %132 = arith.addf %127, %131 : vector<32x384xf32>
    %c2_144 = arith.constant 2 : index
    %c0_145 = arith.constant 0 : index
    %c0_146 = arith.constant 0 : index
    %133 = vector.load %arg3[%c2_144, %c0_145, %c0_146] : memref<9x32x32xbf16, #tpu.memory_space<vmem>>, vector<1x32x32xbf16>
    %134 = vector.shape_cast %133 : vector<1x32x32xbf16> to vector<32x32xbf16>
    %c0_147 = arith.constant 0 : index
    %c751 = arith.constant 751 : index
    %135 = vector.load %arg7[%c0_147, %c751] : memref<32x1280xbf16, #tpu.memory_space<vmem>>, vector<32x384xbf16>
    %cst_148 = arith.constant dense<0.000000e+00> : vector<32x384xf32>
    %136 = tpu.matmul %134, %135, %cst_148 {dimension_numbers = #tpu.dot_dimension_numbers<[1], [0], [0], [1], [0, 0, 1, 1], [], []>} : vector<32x32xbf16>, vector<32x384xbf16>, vector<32x384xf32> -> vector<32x384xf32>
    %137 = arith.addf %132, %136 : vector<32x384xf32>
    %c3_149 = arith.constant 3 : index
    %c0_150 = arith.constant 0 : index
    %c0_151 = arith.constant 0 : index
    %138 = vector.load %arg3[%c3_149, %c0_150, %c0_151] : memref<9x32x32xbf16, #tpu.memory_space<vmem>>, vector<1x32x32xbf16>
    %139 = vector.shape_cast %138 : vector<1x32x32xbf16> to vector<32x32xbf16>
    %c0_152 = arith.constant 0 : index
    %c767 = arith.constant 767 : index
    %140 = vector.load %arg7[%c0_152, %c767] : memref<32x1280xbf16, #tpu.memory_space<vmem>>, vector<32x384xbf16>
    %cst_153 = arith.constant dense<0.000000e+00> : vector<32x384xf32>
    %141 = tpu.matmul %139, %140, %cst_153 {dimension_numbers = #tpu.dot_dimension_numbers<[1], [0], [0], [1], [0, 0, 1, 1], [], []>} : vector<32x32xbf16>, vector<32x384xbf16>, vector<32x384xf32> -> vector<32x384xf32>
    %142 = arith.addf %137, %141 : vector<32x384xf32>
    %c4_154 = arith.constant 4 : index
    %c0_155 = arith.constant 0 : index
    %c0_156 = arith.constant 0 : index
    %143 = vector.load %arg3[%c4_154, %c0_155, %c0_156] : memref<9x32x32xbf16, #tpu.memory_space<vmem>>, vector<1x32x32xbf16>
    %144 = vector.shape_cast %143 : vector<1x32x32xbf16> to vector<32x32xbf16>
    %c0_157 = arith.constant 0 : index
    %c768_158 = arith.constant 768 : index
    %145 = vector.load %arg7[%c0_157, %c768_158] : memref<32x1280xbf16, #tpu.memory_space<vmem>>, vector<32x384xbf16>
    %cst_159 = arith.constant dense<0.000000e+00> : vector<32x384xf32>
    %146 = tpu.matmul %144, %145, %cst_159 {dimension_numbers = #tpu.dot_dimension_numbers<[1], [0], [0], [1], [0, 0, 1, 1], [], []>} : vector<32x32xbf16>, vector<32x384xbf16>, vector<32x384xf32> -> vector<32x384xf32>
    %147 = arith.addf %142, %146 : vector<32x384xf32>
    %c5_160 = arith.constant 5 : index
    %c0_161 = arith.constant 0 : index
    %c0_162 = arith.constant 0 : index
    %148 = vector.load %arg3[%c5_160, %c0_161, %c0_162] : memref<9x32x32xbf16, #tpu.memory_space<vmem>>, vector<1x32x32xbf16>
    %149 = vector.shape_cast %148 : vector<1x32x32xbf16> to vector<32x32xbf16>
    %c0_163 = arith.constant 0 : index
    %c769 = arith.constant 769 : index
    %150 = vector.load %arg7[%c0_163, %c769] : memref<32x1280xbf16, #tpu.memory_space<vmem>>, vector<32x384xbf16>
    %cst_164 = arith.constant dense<0.000000e+00> : vector<32x384xf32>
    %151 = tpu.matmul %149, %150, %cst_164 {dimension_numbers = #tpu.dot_dimension_numbers<[1], [0], [0], [1], [0, 0, 1, 1], [], []>} : vector<32x32xbf16>, vector<32x384xbf16>, vector<32x384xf32> -> vector<32x384xf32>
    %152 = arith.addf %147, %151 : vector<32x384xf32>
    %c6_165 = arith.constant 6 : index
    %c0_166 = arith.constant 0 : index
    %c0_167 = arith.constant 0 : index
    %153 = vector.load %arg3[%c6_165, %c0_166, %c0_167] : memref<9x32x32xbf16, #tpu.memory_space<vmem>>, vector<1x32x32xbf16>
    %154 = vector.shape_cast %153 : vector<1x32x32xbf16> to vector<32x32xbf16>
    %c0_168 = arith.constant 0 : index
    %c785 = arith.constant 785 : index
    %155 = vector.load %arg7[%c0_168, %c785] : memref<32x1280xbf16, #tpu.memory_space<vmem>>, vector<32x384xbf16>
    %cst_169 = arith.constant dense<0.000000e+00> : vector<32x384xf32>
    %156 = tpu.matmul %154, %155, %cst_169 {dimension_numbers = #tpu.dot_dimension_numbers<[1], [0], [0], [1], [0, 0, 1, 1], [], []>} : vector<32x32xbf16>, vector<32x384xbf16>, vector<32x384xf32> -> vector<32x384xf32>
    %157 = arith.addf %152, %156 : vector<32x384xf32>
    %c7_170 = arith.constant 7 : index
    %c0_171 = arith.constant 0 : index
    %c0_172 = arith.constant 0 : index
    %158 = vector.load %arg3[%c7_170, %c0_171, %c0_172] : memref<9x32x32xbf16, #tpu.memory_space<vmem>>, vector<1x32x32xbf16>
    %159 = vector.shape_cast %158 : vector<1x32x32xbf16> to vector<32x32xbf16>
    %c0_173 = arith.constant 0 : index
    %c786 = arith.constant 786 : index
    %160 = vector.load %arg7[%c0_173, %c786] : memref<32x1280xbf16, #tpu.memory_space<vmem>>, vector<32x384xbf16>
    %cst_174 = arith.constant dense<0.000000e+00> : vector<32x384xf32>
    %161 = tpu.matmul %159, %160, %cst_174 {dimension_numbers = #tpu.dot_dimension_numbers<[1], [0], [0], [1], [0, 0, 1, 1], [], []>} : vector<32x32xbf16>, vector<32x384xbf16>, vector<32x384xf32> -> vector<32x384xf32>
    %162 = arith.addf %157, %161 : vector<32x384xf32>
    %c8_175 = arith.constant 8 : index
    %c0_176 = arith.constant 0 : index
    %c0_177 = arith.constant 0 : index
    %163 = vector.load %arg3[%c8_175, %c0_176, %c0_177] : memref<9x32x32xbf16, #tpu.memory_space<vmem>>, vector<1x32x32xbf16>
    %164 = vector.shape_cast %163 : vector<1x32x32xbf16> to vector<32x32xbf16>
    %c0_178 = arith.constant 0 : index
    %c787 = arith.constant 787 : index
    %165 = vector.load %arg7[%c0_178, %c787] : memref<32x1280xbf16, #tpu.memory_space<vmem>>, vector<32x384xbf16>
    %cst_179 = arith.constant dense<0.000000e+00> : vector<32x384xf32>
    %166 = tpu.matmul %164, %165, %cst_179 {dimension_numbers = #tpu.dot_dimension_numbers<[1], [0], [0], [1], [0, 0, 1, 1], [], []>} : vector<32x32xbf16>, vector<32x384xbf16>, vector<32x384xf32> -> vector<32x384xf32>
    %167 = arith.addf %162, %166 : vector<32x384xf32>
    %c1_180 = arith.constant 1 : index
    %c0_181 = arith.constant 0 : index
    %c0_182 = arith.constant 0 : index
    %168 = vector.load %arg5[%c1_180, %c0_181, %c0_182] : memref<2x32x384xf32, #tpu.memory_space<vmem>>, vector<1x32x384xf32>
    %169 = vector.shape_cast %168 : vector<1x32x384xf32> to vector<32x384xf32>
    %170 = vector.shape_cast %167 : vector<32x384xf32> to vector<1x32x384xf32>
    tpu.vector_store %arg5[%c1_180, %c0_181, %c0_182], %170 {strides = array<i32>} : memref<2x32x384xf32, #tpu.memory_space<vmem>>, vector<1x32x384xf32>,
    return
  }
  func.func @transform_0(%arg0: i32) -> (i32, i32, i32) {
    %c0_i32 = arith.constant 0 : i32
    %c0_i32_0 = arith.constant 0 : i32
    %c0_i32_1 = arith.constant 0 : i32
    return %arg0, %c0_i32, %c0_i32_0 : i32, i32, i32
  }
  func.func @transform_1(%arg0: i32) -> (i32, i32) {
    %c0_i32 = arith.constant 0 : i32
    %c0_i32_0 = arith.constant 0 : i32
    %c0_i32_1 = arith.constant 0 : i32
    return %c0_i32, %c0_i32_0 : i32, i32
  }
  func.func @transform_2(%arg0: i32) -> (i32, i32, i32) {
    %c0_i32 = arith.constant 0 : i32
    %c0_i32_0 = arith.constant 0 : i32
    %c0_i32_1 = arith.constant 0 : i32
    %c0_i32_2 = arith.constant 0 : i32
    return %c0_i32, %c0_i32_0, %c0_i32_1 : i32, i32, i32
  }
  func.func @transform_3(%arg0: i32) -> (i32, i32) {
    %c0_i32 = arith.constant 0 : i32
    %c0_i32_0 = arith.constant 0 : i32
    %c0_i32_1 = arith.constant 0 : i32
    return %c0_i32, %c0_i32_0 : i32, i32
  }
  func.func @transform_4(%arg0: i32) -> (i32, i32, i32) {
    %c0_i32 = arith.constant 0 : i32
    %c0_i32_0 = arith.constant 0 : i32
    %c0_i32_1 = arith.constant 0 : i32
    return %arg0, %c0_i32, %c0_i32_0 : i32, i32, i32
  }
}

</mosaic_0001>

<bundles_post_ra>
// kernel: tpu_custom_call.1
= control target key start
LH: loop header
LB: loop body
LE: loop exit
PB: predicated region body
PF: predicated region fallthrough
CT: control target
= control target key end

     0   :  { %9 = vsyncpa [#allocation5], 0  ;;  %s5639_s0 = inlined_call_operand.hbm [shape: bf16[2,16,512], index: 0, kind: input, shape index: {}]   ;;  %s5640_s1 = inlined_call_operand.hbm [shape: bf16[32,144], index: 1, kind: input, shape index: {}]   ;;  %s5641_s2 = inlined_call_operand.hbm [shape: bf16[9,32,32], index: 2, kind: input, shape index: {}]   ;;  %s5642_s3 = inlined_call_operand.vmem [shape: f32[1,768], index: 3, kind: input, shape index: {}]   ;;  %s5643_s4 = inlined_call_operand.hbm [shape: f32[2,32,384], index: 4, kind: output, shape index: {}]  }
   0x1   :  { %10 = vsyncpa [#allocation8], 0 }
   0x2   :  { %11 = vsyncpa [#allocation6], 0  ;;  %s4837_s15 = smov [#allocation7]   ;;  %s4743_s19 = scalar_lea.hbm %s5640_s1, 512 }
   0x3   :  { %s29_s16 = sshll.u32 %s4837_s15, 4  ;;  %p4744_p0 = scmp.ne.s32.totalorder %s5640_s1, %s4743_s19  ;;  %s30_s16 = int_to_ptr.vmem [resolvable:$true] %s29_s16 }
   0x4   :  { %p4747_p1 = scmp.lt.u32.totalorder %s4743_s19, %s5640_s1 }
   0x6   :  { %p4749_p2 = pnand %p4747_p1, %p4744_p0 }
   0x8   :  { %4752 = shalt.err (!%p4749_p2)
}
   0x9   :  { %s4753_s24 = scalar_lea.vmem %s30_s16, 512  ;;  %p4758_p4 = scmp.lt.s32.totalorder %s30_s16, %s30_s16 }
   0xa   :  { %p4754_p3 = scmp.ne.s32.totalorder %s30_s16, %s4753_s24  ;;  %p4759_p5 = scmp.lt.s32.totalorder %s4753_s24, %s4753_s24 }
   0xc   :  { %p4760_p6 = por %p4759_p5, %p4758_p4 }
   0xe   :  { %p4761_p7 = pnand %p4760_p6, %p4754_p3 }
  0x10   :  { %4764 = shalt.err (!%p4761_p7)
}
  0x11   :  { %s4838_s25 = smov 128   ;;  %s4839_s26 = smov 8  }
  0x12   :  { %35 = dma.hbm_to_vmem [thread:$0]  %s5640_s1, 512, %s30_s16, [#allocation8], %s4838_s25, %s4838_s25, %s4839_s26  }
  0x13   :  { %s4840_s29 = smov [#allocation4]   ;;  %s4765_s7 = scalar_lea.hbm %s5639_s0, 1024 }
  0x14   :  { %s17_s30 = sshll.u32 %s4840_s29, 4  ;;  %p4766_p8 = scmp.ne.s32.totalorder %s5639_s0, %s4765_s7  ;;  %s18_s30 = int_to_ptr.vmem [resolvable:$true] %s17_s30 }
  0x15   :  { %p4769_p9 = scmp.lt.u32.totalorder %s4765_s7, %s5639_s0 }
  0x17   :  { %p4771_p10 = pnand %p4769_p9, %p4766_p8 }
  0x19   :  { %4774 = shalt.err (!%p4771_p10)
}
  0x1a   :  { %s4775_s12 = scalar_lea.vmem %s18_s30, 1024  ;;  %p4780_p12 = scmp.lt.s32.totalorder %s18_s30, %s18_s30 }
  0x1b   :  { %p4776_p11 = scmp.ne.s32.totalorder %s18_s30, %s4775_s12  ;;  %p4781_p13 = scmp.lt.s32.totalorder %s4775_s12, %s4775_s12 }
  0x1d   :  { %p4782_p0 = por %p4781_p13, %p4780_p12 }
  0x1f   :  { %p4783_p1 = pnand %p4782_p0, %p4776_p11 }
  0x21   :  { %4786 = shalt.err (!%p4783_p1)
}
  0x22   :  { %s4841_s1 = smov 256   ;;  %s4842_s13 = smov 16  }
  0x23   :  { %23 = dma.hbm_to_vmem [thread:$0]  %s5639_s0, 1024, %s18_s30, [#allocation5], %s4841_s1, %s4841_s1, %s4842_s13  }
  0x24   :  { %s4843_s16 = smov [#allocation9]   ;;  %s4787_s20 = scalar_lea.hbm %s5641_s2, 2304 }
  0x25   :  { %s41_s17 = sshll.u32 %s4843_s16, 4  ;;  %p4788_p2 = scmp.ne.s32.totalorder %s5641_s2, %s4787_s20  ;;  %s42_s17 = int_to_ptr.vmem [resolvable:$true] %s41_s17 }
  0x26   :  { %p4791_p3 = scmp.lt.u32.totalorder %s4787_s20, %s5641_s2 }
  0x28   :  { %p4793_p4 = pnand %p4791_p3, %p4788_p2 }
  0x2a   :  { %4796 = shalt.err (!%p4793_p4)
}
  0x2b   :  { %s4797_s25 = scalar_lea.vmem %s42_s17, 2304  ;;  %p4802_p6 = scmp.lt.s32.totalorder %s42_s17, %s42_s17 }
  0x2c   :  { %p4798_p5 = scmp.ne.s32.totalorder %s42_s17, %s4797_s25  ;;  %p4803_p7 = scmp.lt.s32.totalorder %s4797_s25, %s4797_s25 }
  0x2e   :  { %p4804_p8 = por %p4803_p7, %p4802_p6 }
  0x30   :  { %p4805_p9 = pnand %p4804_p8, %p4798_p5 }
  0x32   :  { %4808 = shalt.err (!%p4805_p9)
}
  0x33   :  { %s4844_s0 = smov 64   ;;  %s4845_s26 = smov 4  }
  0x34   :  { %47 = dma.hbm_to_vmem [thread:$0]  %s5641_s2, 2304, %s42_s17, [#allocation8], %s4844_s0, %s4844_s0, %s4845_s26  }
  0x35   :  { %4831 = dma.done.wait [#allocation5], 1024  }
  0x36   :  { %4832 = vsyncadd [#allocation5], 4294966272 }
  0x37   :  { %4833 = dma.done.wait [#allocation8], 2816  }
  0x38   :  { %4834 = vsyncadd [#allocation8], 4294964480  ;;  %v4686_v0 = vld [vmem:[#allocation4 + $0x4] ss:$16 sps:$4 sm:$0xff]   ;;  %v4688_v1 = vld [vmem:[#allocation4] ss:$16 sps:$4 sm:$0xff]  }
  0x39   :  { %s4846_s29 = smov 127   ;;  %v4689_v2 = vld [vmem:[#allocation4 + $0x8] ss:$16 sps:$4 sm:$0xff]   ;;  %790 = vmatprep.subr.bf16.mxu0 %v4686_v0  ;;  %v4926_v3 = vld [vmem:[#allocation4 + $0x20] ss:$16 sps:$4 sm:$0xff]   ;;  %s4847_s2 = smov 126  }
  0x3a   :  { %105 = vrot.lane.b32.xlu0 %v4686_v0, %s4846_s29  ;;  %103 = vrot.lane.b32.xlu1 %v4688_v1, %s4846_s29  ;;  %s4848_s30 = smov 110   ;;  %v4698_v4 = vld [vmem:[#allocation4 + $0x8] ss:$16 sps:$4 sm:$0xff]   ;;  %s4849_s5 = smov 109   ;;  %v4941_v5 = vld [vmem:[#allocation4 + $0x24] ss:$16 sps:$4 sm:$0xff]  }
  0x3b   :  { %791 = vmatpush1.bf16.msra.mxu0 %v4688_v1  ;;  %843 = vmatprep.subr.bf16.mxu1 %v4926_v3  ;;  %s4850_s6 = smov 108   ;;  %v4694_v6 = vld [vmem:[#allocation4 + $0xc] ss:$16 sps:$4 sm:$0xff]   ;;  %s4851_s7 = smov 92   ;;  %vm783_vm0 = vcmask 130048   ;;  %vm111_vm1 = vcmask 1039360  }
  0x3c   :  { %844 = vmatpush1.bf16.msra.mxu1 %v4698_v4  ;;  %s4852_s8 = smov 91   ;;  %s4853_s9 = smov 90   ;;  %v4967_v7 = vld [vmem:[#allocation7 + $0x4] ss:$8 sps:$4 sm:$0xff]   ;;  %v4695_v8 = vld [vmem:[#allocation4 + $0x28] ss:$16 sps:$4 sm:$0xff]  }
  0x3d   :  { %4068 = vmatprep.mubr.msk.bf16.mxu0 %vm783_vm0, %v4967_v7  ;;  %4070 = vmatprep.mubr.msk.bf16.mxu1 %vm783_vm0, %v4967_v7  ;;  %v4697_v9 = vld [vmem:[#allocation4 + $0x2c] ss:$16 sps:$4 sm:$0xff]   ;;  %vm149_vm2 = vcmask 1031168   ;;  %vm187_vm3 = vcmask 900096   ;;  %vm225_vm4 = vcmask 891904   ;;  %vm263_vm5 = vcmask 883712  }
  0x3e   :  { %107 = vrot.lane.b32.xlu0 %v4689_v2, %s4846_s29  ;;  %143 = vrot.lane.b32.xlu1 %v4686_v0, %s4847_s2  ;;  %vm301_vm6 = vcmask 752640   ;;  %vm339_vm7 = vcmask 744448   ;;  %vm377_vm8 = vcmask 736256   ;;  %v4701_v63 = vld [vmem:[#allocation4 + $0x28] ss:$16 sps:$4 sm:$0xff]   ;;  %s4855_s10 = smov 18  }
  0x3f   :  { %v5063_v4 = vld [vmem:[#allocation7 + $0x14] ss:$8 sps:$4 sm:$0xff]   ;;  %vm1125_vm9 = vcmask 261120   ;;  %s4857_s1 = smov 17   ;;  %s4858_s13 = smov 1   ;;  %vm1112_vm10 = vcmask 146432  }
  0x40   :  { %s4859_s14 = smov 111   ;;  %vm1260_vm11 = vcmask 154624   ;;  %vm1412_vm12 = vcmask 138240   ;;  %vm1576_vm13 = vcmask 7168   ;;  %vm2054_vm14 = vcmask 908288   ;;  %s4860_s15 = smov [#allocation10]  }
  0x41   :  { %s3981_s16 = sshll.u32 %s4860_s15, 4  ;;  %s3982_s16 = int_to_ptr.vmem [resolvable:$true] %s3981_s16 }
  0x42   :  { %145 = vrot.lane.b32.xlu0 %v4689_v2, %s4847_s2  ;;  %141 = vrot.lane.b32.xlu1 %v4688_v1, %s4847_s2  ;;  %s4809_s17 = scalar_lea.vmem %s3982_s16, 3072  ;;  %p4814_p11 = scmp.lt.s32.totalorder %s3982_s16, %s3982_s16 }
  0x43   :  { %p4810_p10 = scmp.ne.s32.totalorder %s3982_s16, %s4809_s17  ;;  %p4815_p12 = scmp.lt.s32.totalorder %s4809_s17, %s4809_s17 }
  0x45   :  { %p4816_p13 = por %p4815_p12, %p4814_p11 }
  0x46   :  { %181 = vrot.lane.b32.xlu0 %v4686_v0, %s4848_s30  ;;  %183 = vrot.lane.b32.xlu1 %v4689_v2, %s4848_s30 }
  0x47   :  { %p4817_p0 = pnand %p4816_p13, %p4810_p10 }
  0x4a   :  { %179 = vrot.lane.b32.xlu0 %v4688_v1, %s4848_s30  ;;  %219 = vrot.lane.b32.xlu1 %v4686_v0, %s4849_s5 }
  0x4e   :  { %221 = vrot.lane.b32.xlu0 %v4689_v2, %s4849_s5  ;;  %217 = vrot.lane.b32.xlu1 %v4688_v1, %s4849_s5 }
  0x52   :  { %257 = vrot.lane.b32.xlu0 %v4686_v0, %s4850_s6  ;;  %259 = vrot.lane.b32.xlu1 %v4689_v2, %s4850_s6 }
  0x56   :  { %255 = vrot.lane.b32.xlu0 %v4688_v1, %s4850_s6  ;;  %431 = vrot.lane.b32.xlu1 %v4926_v3, %s4846_s29 }
  0x5a   :  { %433 = vrot.lane.b32.xlu0 %v4941_v5, %s4846_s29  ;;  %109 = vrot.lane.b32.xlu1 %v4694_v6, %s4846_s29 }
  0x5e   :  { %295 = vrot.lane.b32.xlu0 %v4686_v0, %s4851_s7  ;;  %297 = vrot.lane.b32.xlu1 %v4689_v2, %s4851_s7 }
  0x62   :  { %293 = vrot.lane.b32.xlu0 %v4688_v1, %s4851_s7  ;;  %468 = vrot.lane.b32.xlu1 %v4926_v3, %s4847_s2 }
  0x66   :  { %470 = vrot.lane.b32.xlu0 %v4941_v5, %s4847_s2  ;;  %147 = vrot.lane.b32.xlu1 %v4694_v6, %s4847_s2 }
  0x6a   :  { %333 = vrot.lane.b32.xlu0 %v4686_v0, %s4852_s8  ;;  %335 = vrot.lane.b32.xlu1 %v4689_v2, %s4852_s8 }
  0x6e   :  { %331 = vrot.lane.b32.xlu0 %v4688_v1, %s4852_s8  ;;  %505 = vrot.lane.b32.xlu1 %v4926_v3, %s4848_s30 }
  0x72   :  { %507 = vrot.lane.b32.xlu0 %v4941_v5, %s4848_s30  ;;  %185 = vrot.lane.b32.xlu1 %v4694_v6, %s4848_s30 }
  0x76   :  { %371 = vrot.lane.b32.xlu0 %v4686_v0, %s4853_s9  ;;  %373 = vrot.lane.b32.xlu1 %v4689_v2, %s4853_s9 }
  0x7a   :  { %369 = vrot.lane.b32.xlu0 %v4688_v1, %s4853_s9  ;;  %542 = vrot.lane.b32.xlu1 %v4926_v3, %s4849_s5 }
  0x7e   :  { %544 = vrot.lane.b32.xlu0 %v4941_v5, %s4849_s5  ;;  %223 = vrot.lane.b32.xlu1 %v4694_v6, %s4849_s5 }
  0x82   :  { %579 = vrot.lane.b32.xlu0 %v4926_v3, %s4850_s6  ;;  %581 = vrot.lane.b32.xlu1 %v4941_v5, %s4850_s6 }
  0x86   :  { %261 = vrot.lane.b32.xlu0 %v4694_v6, %s4850_s6  ;;  %435 = vrot.lane.b32.xlu1 %v4695_v8, %s4846_s29 }
  0x8a   :  { %437 = vrot.lane.b32.xlu0 %v4697_v9, %s4846_s29  ;;  %616 = vrot.lane.b32.xlu1 %v4926_v3, %s4851_s7 }
  0x8e   :  { %618 = vrot.lane.b32.xlu0 %v4941_v5, %s4851_s7  ;;  %299 = vrot.lane.b32.xlu1 %v4694_v6, %s4851_s7 }
  0x92   :  { %472 = vrot.lane.b32.xlu0 %v4695_v8, %s4847_s2  ;;  %474 = vrot.lane.b32.xlu1 %v4697_v9, %s4847_s2 }
  0x96   :  { %653 = vrot.lane.b32.xlu0 %v4926_v3, %s4852_s8  ;;  %655 = vrot.lane.b32.xlu1 %v4941_v5, %s4852_s8 }
  0x9a   :  { %337 = vrot.lane.b32.xlu0 %v4694_v6, %s4852_s8  ;;  %509 = vrot.lane.b32.xlu1 %v4695_v8, %s4848_s30 }
  0x9e   :  { %511 = vrot.lane.b32.xlu0 %v4697_v9, %s4848_s30  ;;  %690 = vrot.lane.b32.xlu1 %v4926_v3, %s4853_s9  ;;  %v5061_v3 = vld [vmem:[#allocation7] ss:$8 sps:$4 sm:$0xff]  }
  0xa2   :  { %692 = vrot.lane.b32.xlu0 %v4941_v5, %s4853_s9  ;;  %375 = vrot.lane.b32.xlu1 %v4694_v6, %s4853_s9 }
  0xa6   :  { %546 = vrot.lane.b32.xlu0 %v4695_v8, %s4849_s5  ;;  %548 = vrot.lane.b32.xlu1 %v4697_v9, %s4849_s5 }
  0xaa   :  { %583 = vrot.lane.b32.xlu0 %v4695_v8, %s4850_s6  ;;  %585 = vrot.lane.b32.xlu1 %v4697_v9, %s4850_s6 }
  0xac   :  { %v106_v10 = vpop.permute.xlu0 %105  ;;  %v104_v11 = vpop.permute.xlu1 %103 }
  0xad   :  { %v112_v15 = vsel %vm111_vm1, %v104_v11, %v106_v10 }
  0xae   :  { %620 = vrot.lane.b32.xlu0 %v4695_v8, %s4851_s7  ;;  %622 = vrot.lane.b32.xlu1 %v4697_v9, %s4851_s7 }
  0xb0   :  { %v108_v12 = vpop.permute.xlu0 %107  ;;  %v144_v13 = vpop.permute.xlu1 %143 }
  0xb1   :  { %v113_v14 = vsel %vm111_vm1, %v106_v10, %v108_v12 }
  0xb2   :  { %657 = vrot.lane.b32.xlu0 %v4695_v8, %s4852_s8  ;;  %792 = vmatprep.subr.bf16.mxu0 %v113_v14 }
  0xb3   :  { %659 = vrot.lane.b32.xlu1 %v4697_v9, %s4852_s8  ;;  %793 = vmatpush1.bf16.msra.mxu0 %v112_v15 }
  0xb4   :  { %v146_v16 = vpop.permute.xlu0 %145  ;;  %v142_v17 = vpop.permute.xlu1 %141 }
  0xb5   :  { %v151_v18 = vsel %vm149_vm2, %v144_v13, %v146_v16  ;;  %v150_v19 = vsel %vm149_vm2, %v142_v17, %v144_v13  ;;  %v5072_v13 = vld [vmem:[#allocation7 + $0x10] ss:$8 sps:$4 sm:$0xff]  }
  0xb6   :  { %694 = vrot.lane.b32.xlu0 %v4695_v8, %s4853_s9  ;;  %794 = vmatprep.subr.bf16.mxu0 %v151_v18 }
  0xb7   :  { %696 = vrot.lane.b32.xlu1 %v4697_v9, %s4853_s9  ;;  %795 = vmatpush1.bf16.msra.mxu0 %v150_v19 }
  0xb8   :  { %v182_v20 = vpop.permute.xlu0 %181  ;;  %v184_v21 = vpop.permute.xlu1 %183 }
  0xb9   :  { %v189_v22 = vsel %vm187_vm3, %v182_v20, %v184_v21 }
  0xba   :  { %796 = vmatprep.subr.bf16.mxu0 %v189_v22 }
  0xbc   :  { %v180_v23 = vpop.permute.xlu0 %179  ;;  %v220_v24 = vpop.permute.xlu1 %219 }
  0xbd   :  { %v188_v25 = vsel %vm187_vm3, %v180_v23, %v182_v20 }
  0xbe   :  { %797 = vmatpush1.bf16.msra.mxu0 %v188_v25 }
  0xc0   :  { %v5021_v26 = vpop.permute.xlu0 %221  ;;  %v218_v27 = vpop.permute.xlu1 %217 }
  0xc1   :  { %v227_v28 = vsel %vm225_vm4, %v220_v24, %v5021_v26  ;;  %v226_v29 = vsel %vm225_vm4, %v218_v27, %v220_v24 }
  0xc2   :  { %798 = vmatprep.subr.bf16.mxu0 %v227_v28 }
  0xc3   :  { %799 = vmatpush1.bf16.msra.mxu0 %v226_v29 }
  0xc4   :  { %v258_v30 = vpop.permute.xlu0 %257  ;;  %v5026_v31 = vpop.permute.xlu1 %259 }
  0xc5   :  { %v265_v32 = vsel %vm263_vm5, %v258_v30, %v5026_v31 }
  0xc6   :  { %800 = vmatprep.subr.bf16.mxu0 %v265_v32 }
  0xc8   :  { %v256_v33 = vpop.permute.xlu0 %255  ;;  %v432_v34 = vpop.permute.xlu1 %431 }
  0xc9   :  { %v264_v35 = vsel %vm263_vm5, %v256_v33, %v258_v30 }
  0xca   :  { %801 = vmatpush1.bf16.msra.mxu0 %v264_v35 }
  0xcc   :  { %v5031_v36 = vpop.permute.xlu0 %433  ;;  %v110_v37 = vpop.permute.xlu1 %109 }
  0xcd   :  { %v439_v38 = vsel %vm111_vm1, %v432_v34, %v5031_v36  ;;  %v114_v39 = vsel %vm111_vm1, %v108_v12, %v110_v37 }
  0xce   :  { %845 = vmatprep.subr.bf16.mxu1 %v439_v38 }
  0xcf   :  { %846 = vmatpush1.bf16.msra.mxu1 %v114_v39 }
  0xd0   :  { %v296_v40 = vpop.permute.xlu0 %295  ;;  %v5036_v41 = vpop.permute.xlu1 %297 }
  0xd1   :  { %v303_v42 = vsel %vm301_vm6, %v296_v40, %v5036_v41 }
  0xd2   :  { %802 = vmatprep.subr.bf16.mxu0 %v303_v42 }
  0xd4   :  { %v294_v43 = vpop.permute.xlu0 %293  ;;  %v469_v44 = vpop.permute.xlu1 %468 }
  0xd5   :  { %v302_v45 = vsel %vm301_vm6, %v294_v43, %v296_v40 }
  0xd6   :  { %803 = vmatpush1.bf16.msra.mxu0 %v302_v45 }
  0xd8   :  { %v5041_v46 = vpop.permute.xlu0 %470  ;;  %v148_v47 = vpop.permute.xlu1 %147 }
  0xd9   :  { %v476_v48 = vsel %vm149_vm2, %v469_v44, %v5041_v46  ;;  %v152_v49 = vsel %vm149_vm2, %v146_v16, %v148_v47 }
  0xda   :  { %847 = vmatprep.subr.bf16.mxu1 %v476_v48 }
  0xdb   :  { %848 = vmatpush1.bf16.msra.mxu1 %v152_v49 }
  0xdc   :  { %v334_v50 = vpop.permute.xlu0 %333  ;;  %v5046_v51 = vpop.permute.xlu1 %335 }
  0xdd   :  { %v341_v52 = vsel %vm339_vm7, %v334_v50, %v5046_v51 }
  0xde   :  { %804 = vmatprep.subr.bf16.mxu0 %v341_v52 }
  0xe0   :  { %v332_v53 = vpop.permute.xlu0 %331  ;;  %v506_v54 = vpop.permute.xlu1 %505 }
  0xe1   :  { %v340_v55 = vsel %vm339_vm7, %v332_v53, %v334_v50 }
  0xe2   :  { %805 = vmatpush1.bf16.msra.mxu0 %v340_v55 }
  0xe4   :  { %v5051_v56 = vpop.permute.xlu0 %507  ;;  %v186_v57 = vpop.permute.xlu1 %185 }
  0xe5   :  { %v513_v58 = vsel %vm187_vm3, %v506_v54, %v5051_v56  ;;  %v190_v59 = vsel %vm187_vm3, %v184_v21, %v186_v57 }
  0xe6   :  { %849 = vmatprep.subr.bf16.mxu1 %v513_v58 }
  0xe7   :  { %850 = vmatpush1.bf16.msra.mxu1 %v190_v59 }
  0xe8   :  { %v372_v60 = vpop.permute.xlu0 %371  ;;  %v5056_v61 = vpop.permute.xlu1 %373 }
  0xe9   :  { %v379_v62 = vsel %vm377_vm8, %v372_v60, %v5056_v61 }
  0xea   :  { %806 = vmatprep.subr.bf16.mxu0 %v379_v62  ;;  %v4854_v62 = vmov 0  }
  0xeb   :  { %4617 = vrot.lane.b32.xlu0 %v4854_v62, %s4855_s10 }
  0xec   :  { %v370_v0 = vpop.permute.xlu0 %369  ;;  %v543_v1 = vpop.permute.xlu1 %542 }
  0xed   :  { %v378_v2 = vsel %vm377_vm8, %v370_v0, %v372_v60 }
  0xee   :  { %807 = vmatpush1.bf16.msra.mxu0 %v378_v2  ;;  %v5125_v2 = vld [vmem:[%s5642_s3] sm:$0x3f]  ;;  %s4856_s3 = smov 19  }
  0xef   :  { %896 = vmatprep.subr.bf16.mxu0 %v4701_v63  ;;  %v975_v63 = vlaneseq }
  0xf0   :  { %v545_v6 = vpop.permute.xlu0 %544  ;;  %v224_v8 = vpop.permute.xlu1 %223 }
  0xf1   :  { %v550_v9 = vsel %vm225_vm4, %v543_v1, %v545_v6  ;;  %823 = vmatmul.mubr.bf16.vlgmr.msra.gmra.mrb[0].mxu0 %v5061_v3  ;;  %v228_v10 = vsel %vm225_vm4, %v5021_v26, %v224_v8  ;;  %v5119_v0 = vshrl.u32 %v975_v63, 7 }
  0xf2   :  { %851 = vmatprep.subr.bf16.mxu1 %v550_v9  ;;  %897 = vmatpush1.bf16.msra.mxu0 %v4941_v5 }
  0xf3   :  { %852 = vmatpush1.bf16.msra.mxu1 %v228_v10  ;;  %4069 = vmatprep.mubr.msk.bf16.mxu0 %vm783_vm0, %v5063_v4  ;;  %v977_v1 = vsub.s32 0, %v5119_v0 }
  0xf4   :  { %v580_v11 = vpop.permute.xlu0 %579  ;;  %v582_v12 = vpop.permute.xlu1 %581 }
  0xf5   :  { %v587_v14 = vsel %vm263_vm5, %v580_v11, %v582_v12 }
  0xf6   :  { %853 = vmatprep.subr.bf16.mxu1 %v587_v14 }
  0xf8   :  { %v262_v15 = vpop.permute.xlu0 %261  ;;  %v436_v16 = vpop.permute.xlu1 %435 }
  0xf9   :  { %v266_v17 = vsel %vm263_vm5, %v5026_v31, %v262_v15  ;;  %833 = vmatmul.mubr.bf16.gmra.mrb[4].mxu0 %v5072_v13  ;;  %v440_v20 = vsel %vm111_vm1, %v5031_v36, %v436_v16 }
  0xfa   :  { %854 = vmatpush1.bf16.msra.mxu1 %v266_v17  ;;  %4072 = vmatprep.mubr.msk.bf16.mxu0 %vm783_vm0, %v4967_v7 }
  0xfc   :  { %v438_v5 = vpop.permute.xlu0 %437  ;;  %v617_v18 = vpop.permute.xlu1 %616 }
  0xfd   :  { %v441_v19 = vsel %vm111_vm1, %v436_v16, %v438_v5 }
  0xfe   :  { %898 = vmatprep.subr.bf16.mxu0 %v441_v19 }
  0xff   :  { %899 = vmatpush1.bf16.msra.mxu0 %v440_v20 }
 0x100   :  { %v619_v21 = vpop.permute.xlu0 %618  ;;  %v300_v22 = vpop.permute.xlu1 %299 }
 0x101   :  { %v624_v23 = vsel %vm301_vm6, %v617_v18, %v619_v21  ;;  %v304_v24 = vsel %vm301_vm6, %v5036_v41, %v300_v22 }
 0x102   :  { %855 = vmatprep.subr.bf16.mxu1 %v624_v23 }
 0x103   :  { %856 = vmatpush1.bf16.msra.mxu1 %v304_v24 }
 0x104   :  { %v473_v25 = vpop.permute.xlu0 %472  ;;  %v475_v7 = vpop.permute.xlu1 %474 }
 0x105   :  { %v477_v26 = vsel %vm149_vm2, %v5041_v46, %v473_v25  ;;  %v478_v27 = vsel %vm149_vm2, %v473_v25, %v475_v7 }
 0x106   :  { %900 = vmatprep.subr.bf16.mxu0 %v478_v27 }
 0x107   :  { %901 = vmatpush1.bf16.msra.mxu0 %v477_v26 }
 0x108   :  { %v654_v28 = vpop.permute.xlu0 %653  ;;  %v656_v29 = vpop.permute.xlu1 %655 }
 0x109   :  { %v661_v30 = vsel %vm339_vm7, %v654_v28, %v656_v29 }
 0x10a   :  { %857 = vmatprep.subr.bf16.mxu1 %v661_v30 }
 0x10c   :  { %v338_v31 = vpop.permute.xlu0 %337  ;;  %v510_v32 = vpop.permute.xlu1 %509 }
 0x10d   :  { %v342_v33 = vsel %vm339_vm7, %v5046_v51, %v338_v31  ;;  %v514_v37 = vsel %vm187_vm3, %v5051_v56, %v510_v32 }
 0x10e   :  { %858 = vmatpush1.bf16.msra.mxu1 %v342_v33 }
 0x110   :  { %v512_v34 = vpop.permute.xlu0 %511  ;;  %v691_v35 = vpop.permute.xlu1 %690 }
 0x111   :  { %v515_v36 = vsel %vm187_vm3, %v510_v32, %v512_v34  ;;  %v985_v34 = vsub.s32 2, %v5119_v0 }
 0x112   :  { %902 = vmatprep.subr.bf16.mxu0 %v515_v36 }
 0x113   :  { %903 = vmatpush1.bf16.msra.mxu0 %v514_v37 }
 0x114   :  { %v693_v38 = vpop.permute.xlu0 %692  ;;  %v376_v39 = vpop.permute.xlu1 %375 }
 0x115   :  { %v698_v40 = vsel %vm377_vm8, %v691_v35, %v693_v38  ;;  %v380_v41 = vsel %vm377_vm8, %v5056_v61, %v376_v39  ;;  %v989_v35 = vsub.s32 3, %v5119_v0 }
 0x116   :  { %859 = vmatprep.subr.bf16.mxu1 %v698_v40 }
 0x117   :  { %860 = vmatpush1.bf16.msra.mxu1 %v380_v41  ;;  %v990_v41 = vrot.slane %v5125_v2, %v989_v35 }
 0x118   :  { %v547_v42 = vpop.permute.xlu0 %546  ;;  %v549_v43 = vpop.permute.xlu1 %548 }
 0x119   :  { %v551_v44 = vsel %vm225_vm4, %v545_v6, %v547_v42  ;;  %v552_v45 = vsel %vm225_vm4, %v547_v42, %v549_v43 }
 0x11a   :  { %876 = vmatmul.mubr.bf16.vlgmr.msra.gmra.mrb[0].mxu1 %v5061_v3  ;;  %904 = vmatprep.subr.bf16.mxu0 %v552_v45 }
 0x11b   :  { %4071 = vmatprep.mubr.msk.bf16.mxu1 %vm783_vm0, %v5063_v4  ;;  %905 = vmatpush1.bf16.msra.mxu0 %v551_v44 }
 0x11c   :  { %v584_v46 = vpop.permute.xlu0 %583  ;;  %v586_v47 = vpop.permute.xlu1 %585 }
 0x11d   :  { %v588_v48 = vsel %vm263_vm5, %v582_v12, %v584_v46  ;;  %v589_v49 = vsel %vm263_vm5, %v584_v46, %v586_v47 }
 0x11e   :  { %906 = vmatprep.subr.bf16.mxu0 %v589_v49 }
 0x11f   :  { %907 = vmatpush1.bf16.msra.mxu0 %v588_v48 }
 0x120   :  { %v621_v50 = vpop.permute.xlu0 %620  ;;  %v623_v51 = vpop.permute.xlu1 %622 }
 0x121   :  { %v625_v52 = vsel %vm301_vm6, %v619_v21, %v621_v50  ;;  %v626_v53 = vsel %vm301_vm6, %v621_v50, %v623_v51 }
 0x122   :  { %886 = vmatmul.mubr.bf16.gmra.mrb[4].mxu1 %v5072_v13  ;;  %908 = vmatprep.subr.bf16.mxu0 %v626_v53 }
 0x123   :  { %909 = vmatpush1.bf16.msra.mxu0 %v625_v52  ;;  %1164 = vmatprep.mubr.bf16.mxu1 %v4854_v62 }
 0x124   :  { %v658_v54 = vpop.permute.xlu0 %657 }
 0x125   :  { %v660_v55 = vpop.permute.xlu1 %659  ;;  %v662_v56 = vsel %vm339_vm7, %v656_v29, %v658_v54 }
 0x126   :  { %v663_v57 = vsel %vm339_vm7, %v658_v54, %v660_v55 }
 0x127   :  { %910 = vmatprep.subr.bf16.mxu0 %v663_v57 }
 0x128   :  { %911 = vmatpush1.bf16.msra.mxu0 %v662_v56  ;;  %v695_v58 = vpop.permute.xlu0 %694 }
 0x129   :  { %v697_v59 = vpop.permute.xlu1 %696  ;;  %v699_v60 = vsel %vm377_vm8, %v693_v38, %v695_v58  ;;  %v986_v38 = vrot.slane %v5125_v2, %v985_v34 }
 0x12a   :  { %v700_v61 = vsel %vm377_vm8, %v695_v58, %v697_v59 }
 0x12b   :  { %912 = vmatprep.subr.bf16.mxu0 %v700_v61 }
 0x12c   :  { %913 = vmatpush1.bf16.msra.mxu0 %v699_v60 }
 0x12f   :  { %929 = vmatmul.mubr.bf16.vlgmr.msra.gmra.mrb[8].mxu0 %v5061_v3  ;;  %v981_v3 = vsub.s32 1, %v5119_v0 }
 0x130   :  { %4073 = vmatprep.mubr.msk.bf16.mxu0 %vm783_vm0, %v5063_v4  ;;  %v978_v4 = vrot.slane %v5125_v2, %v977_v1 }
 0x131   :  { %v982_v8 = vrot.slane %v5125_v2, %v981_v3 }
 0x137   :  { %939 = vmatmul.mubr.bf16.gmra.mrb[12].mxu0 %v5072_v13 }
 0x1c4   :  { %v824_v6 = vpop.f32.mrb[0].mxu0 }
 0x1c5   :  { %v949_v9 = vmax.f32 %v824_v6, 0.0  ;;  %v826_v10 = vpop.f32.mrb[1].mxu0  ;;  %v993_v6 = vsub.s32 4, %v5119_v0 }
 0x1c6   :  { %v950_v11 = vmax.f32 %v826_v10, 0.0  ;;  %v828_v12 = vpop.f32.mrb[2].mxu0 }
 0x1c7   :  { %v1005_v13 = vmul.f32 %v978_v4, %v949_v9  ;;  %v955_v14 = vmax.f32 %v828_v12, 0.0  ;;  %v830_v15 = vpop.f32.mrb[3].mxu0  ;;  %v994_v9 = vrot.slane %v5125_v2, %v993_v6 }
 0x1c8   :  { %v1006_v16 = vmul.f32 %v982_v8, %v950_v11  ;;  %v956_v17 = vmax.f32 %v830_v15, 0.0 }
 0x1c9   :  { %v1011_v5 = vmul.f32 %v978_v4, %v955_v14 }
 0x1ca   :  { %v1012_v18 = vmul.f32 %v982_v8, %v956_v17 }
 0x1cb   :  { %v5130_v19 = vpack.c.bf16 %v1011_v5, %v1005_v13 }
 0x1cc   :  { %v5132_v20 = vpack.c.bf16 %v1012_v18, %v1006_v16  ;;  %v834_v21 = vpop.f32.mrb[4].mxu0 }
 0x1cd   :  { %v961_v22 = vmax.f32 %v834_v21, 0.0  ;;  %v836_v23 = vpop.f32.mrb[5].mxu0  ;;  %1098 = vrot.lane.b32.xlu0 %v5130_v19, %s4855_s10 }
 0x1ce   :  { %v962_v24 = vmax.f32 %v836_v23, 0.0  ;;  %v838_v25 = vpop.f32.mrb[6].mxu0 }
 0x1cf   :  { %v1017_v7 = vmul.f32 %v978_v4, %v961_v22  ;;  %v967_v26 = vmax.f32 %v838_v25, 0.0  ;;  %v840_v27 = vpop.f32.mrb[7].mxu0 }
 0x1d0   :  { %v1018_v28 = vmul.f32 %v982_v8, %v962_v24  ;;  %v968_v29 = vmax.f32 %v840_v27, 0.0 }
 0x1d1   :  { %v1023_v30 = vmul.f32 %v978_v4, %v967_v26 }
 0x1d2   :  { %v1024_v31 = vmul.f32 %v982_v8, %v968_v29  ;;  %v997_v8 = vsub.s32 5, %v5119_v0 }
 0x1d3   :  { %v5136_v32 = vpack.c.bf16 %v1023_v30, %v1017_v7 }
 0x1d4   :  { %v5138_v33 = vpack.c.bf16 %v1024_v31, %v1018_v28  ;;  %v998_v11 = vrot.slane %v5125_v2, %v997_v8 }
 0x1d6   :  { %1108 = vrot.lane.b32.xlu0 %v5138_v33, %s4855_s10 }
 0x1ed   :  { %v877_v36 = vpop.f32.mrb[0].mxu1 }
 0x1ee   :  { %v951_v37 = vmax.f32 %v877_v36, 0.0  ;;  %v879_v39 = vpop.f32.mrb[1].mxu1 }
 0x1ef   :  { %v952_v40 = vmax.f32 %v879_v39, 0.0  ;;  %v881_v42 = vpop.f32.mrb[2].mxu1  ;;  %v4710_v39 = vld [vmem:[#allocation9 + $0x10] sm:$0xff]  }
 0x1f0   :  { %v957_v43 = vmax.f32 %v881_v42, 0.0  ;;  %v883_v44 = vpop.f32.mrb[3].mxu1  ;;  %v1007_v46 = vmul.f32 %v986_v38, %v951_v37  ;;  %4330 = vmatprep.mubr.msk.bf16.mxu0 %vm1125_vm9, %v4710_v39 }
 0x1f1   :  { %v958_v45 = vmax.f32 %v883_v44, 0.0  ;;  %v1008_v48 = vmul.f32 %v990_v41, %v952_v40  ;;  %v4618_v40 = vpop.permute.xlu0 %4617 }
 0x1f2   :  { %v1013_v47 = vmul.f32 %v986_v38, %v957_v43  ;;  %v4619_v43 = vunpack.i.l.bf16 %v4618_v40 }
 0x1f3   :  { %v1014_v49 = vmul.f32 %v990_v41, %v958_v45 }
 0x1f4   :  { %v5146_v50 = vpack.c.bf16 %v1013_v47, %v1007_v46 }
 0x1f5   :  { %v5148_v51 = vpack.c.bf16 %v1014_v49, %v1008_v48  ;;  %v887_v52 = vpop.f32.mrb[4].mxu1  ;;  %v4620_v48 = vunpack.i.h.bf16 %v4618_v40 }
 0x1f6   :  { %v963_v53 = vmax.f32 %v887_v52, 0.0  ;;  %1102 = vrot.lane.b32.xlu1 %v5146_v50, %s4855_s10  ;;  %v889_v54 = vpop.f32.mrb[5].mxu1 }
 0x1f7   :  { %v964_v55 = vmax.f32 %v889_v54, 0.0  ;;  %v891_v56 = vpop.f32.mrb[6].mxu1 }
 0x1f8   :  { %v1019_v57 = vmul.f32 %v986_v38, %v963_v53  ;;  %v969_v58 = vmax.f32 %v891_v56, 0.0  ;;  %v893_v59 = vpop.f32.mrb[7].mxu1 }
 0x1f9   :  { %v1020_v60 = vmul.f32 %v990_v41, %v964_v55  ;;  %v970_v61 = vmax.f32 %v893_v59, 0.0  ;;  %v4706_v55 = vld [vmem:[#allocation9 + $0x10] sm:$0xff]  }
 0x1fa   :  { %v1025_v63 = vmul.f32 %v986_v38, %v969_v58  ;;  %1100 = vrot.lane.b32.xlu1 %v5132_v20, %s4855_s10 }
 0x1fb   :  { %v1026_v1 = vmul.f32 %v990_v41, %v970_v61 }
 0x1fc   :  { %v5154_v3 = vpack.c.bf16 %v1025_v63, %v1019_v57  ;;  %v4707_v63 = vld [vmem:[#allocation9 + $0x18] sm:$0xff]  }
 0x1fd   :  { %v5156_v4 = vpack.c.bf16 %v1026_v1, %v1020_v60 }
 0x1fe   :  { %1106 = vrot.lane.b32.xlu1 %v5136_v32, %s4855_s10  ;;  %1110 = vrot.lane.b32.xlu0 %v5154_v3, %s4855_s10 }
 0x202   :  { %1246 = vrot.lane.b32.xlu1 %v5130_v19, %s4856_s3  ;;  %1248 = vrot.lane.b32.xlu0 %v5132_v20, %s4856_s3  ;;  %v930_v10 = vpop.f32.mrb[8].mxu0 }
 0x203   :  { %v953_v12 = vmax.f32 %v930_v10, 0.0  ;;  %v932_v13 = vpop.f32.mrb[9].mxu0 }
 0x204   :  { %v954_v14 = vmax.f32 %v932_v13, 0.0  ;;  %v934_v15 = vpop.f32.mrb[10].mxu0 }
 0x205   :  { %v1009_v16 = vmul.f32 %v994_v9, %v953_v12  ;;  %v959_v17 = vmax.f32 %v934_v15, 0.0  ;;  %v936_v5 = vpop.f32.mrb[11].mxu0 }
 0x206   :  { %4622 = vrot.lane.b32.xlu1 %v4854_v62, %s4856_s3  ;;  %1254 = vrot.lane.b32.xlu0 %v5136_v32, %s4856_s3  ;;  %v1010_v0 = vmul.f32 %v998_v11, %v954_v14  ;;  %v960_v18 = vmax.f32 %v936_v5, 0.0 }
 0x207   :  { %v1015_v21 = vmul.f32 %v994_v9, %v959_v17 }
 0x208   :  { %v1016_v22 = vmul.f32 %v998_v11, %v960_v18  ;;  %v4708_v18 = vld [vmem:[#allocation9] sm:$0xff]  }
 0x209   :  { %v5174_v23 = vpack.c.bf16 %v1015_v21, %v1009_v16 }
 0x20a   :  { %2707 = vrot.lane.b32.xlu1 %v5148_v51, %s4856_s3  ;;  %1250 = vrot.lane.b32.xlu0 %v5146_v50, %s4856_s3  ;;  %v5180_v2 = vpack.c.bf16 %v1016_v22, %v1010_v0  ;;  %v940_v24 = vpop.f32.mrb[12].mxu0 }
 0x20b   :  { %v965_v25 = vmax.f32 %v940_v24, 0.0  ;;  %v942_v7 = vpop.f32.mrb[13].mxu0 }
 0x20c   :  { %v966_v26 = vmax.f32 %v942_v7, 0.0  ;;  %v944_v27 = vpop.f32.mrb[14].mxu0 }
 0x20d   :  { %v1021_v28 = vmul.f32 %v994_v9, %v965_v25  ;;  %v971_v29 = vmax.f32 %v944_v27, 0.0  ;;  %v946_v30 = vpop.f32.mrb[15].mxu0 }
 0x20e   :  { %4627 = vrot.lane.b32.xlu1 %v4854_v62, %s4856_s3  ;;  %1258 = vrot.lane.b32.xlu0 %v5154_v3, %s4856_s3  ;;  %v1022_v31 = vmul.f32 %v998_v11, %v966_v26  ;;  %v972_v34 = vmax.f32 %v946_v30, 0.0 }
 0x20f   :  { %v1027_v35 = vmul.f32 %v994_v9, %v971_v29  ;;  %v4709_v29 = vld [vmem:[#allocation9 + $0x8] sm:$0xff]  }
 0x210   :  { %v1028_v36 = vmul.f32 %v998_v11, %v972_v34 }
 0x211   :  { %v5186_v37 = vpack.c.bf16 %v1027_v35, %v1021_v28  ;;  %v5330_v35 = vld [vmem:[#allocation9 + $0x18] sm:$0xff]  }
 0x212   :  { %1256 = vrot.lane.b32.xlu1 %v5138_v33, %s4856_s3  ;;  %2563 = vrot.lane.b32.xlu0 %v5174_v23, %s4855_s10  ;;  %v5192_v38 = vpack.c.bf16 %v1028_v36, %v1022_v31 }
 0x216   :  { %2715 = vrot.lane.b32.xlu1 %v5156_v4, %s4856_s3  ;;  %2709 = vrot.lane.b32.xlu0 %v5174_v23, %s4856_s3 }
 0x21a   :  { %2565 = vrot.lane.b32.xlu1 %v5180_v2, %s4855_s10  ;;  %2571 = vrot.lane.b32.xlu0 %v5186_v37, %s4855_s10 }
 0x21e   :  { %2717 = vrot.lane.b32.xlu0 %v5186_v37, %s4856_s3  ;;  %2573 = vrot.lane.b32.xlu1 %v5192_v38, %s4855_s10 }
 0x222   :  { %1400 = vrot.lane.b32.xlu0 %v5132_v20, %s4857_s1  ;;  %1398 = vrot.lane.b32.xlu1 %v5130_v19, %s4857_s1 }
 0x226   :  { %1406 = vrot.lane.b32.xlu0 %v5136_v32, %s4857_s1  ;;  %4632 = vrot.lane.b32.xlu1 %v4854_v62, %s4857_s1 }
 0x22a   :  { %2711 = vrot.lane.b32.xlu0 %v5180_v2, %s4856_s3  ;;  %1408 = vrot.lane.b32.xlu1 %v5138_v33, %s4857_s1 }
 0x22e   :  { %1402 = vrot.lane.b32.xlu0 %v5146_v50, %s4857_s1  ;;  %2857 = vrot.lane.b32.xlu1 %v5148_v51, %s4857_s1 }
 0x232   :  { %2859 = vrot.lane.b32.xlu0 %v5174_v23, %s4857_s1  ;;  %4637 = vrot.lane.b32.xlu1 %v4854_v62, %s4857_s1 }
 0x236   :  { %1410 = vrot.lane.b32.xlu0 %v5154_v3, %s4857_s1  ;;  %2719 = vrot.lane.b32.xlu1 %v5192_v38, %s4856_s3 }
 0x23a   :  { %2867 = vrot.lane.b32.xlu0 %v5186_v37, %s4857_s1  ;;  %2865 = vrot.lane.b32.xlu1 %v5156_v4, %s4857_s1 }
 0x23e   :  { %1564 = vrot.lane.b32.xlu0 %v5132_v20, %s4858_s13  ;;  %1562 = vrot.lane.b32.xlu1 %v5130_v19, %s4858_s13 }
 0x23f   :  { %v1099_v41 = vpop.permute.xlu0 %1098 }
 0x240   :  { %v1113_v47 = vsel %vm1112_vm10, %v4619_v43, %v1099_v41 }
 0x242   :  { %1570 = vrot.lane.b32.xlu0 %v5136_v32, %s4858_s13  ;;  %4642 = vrot.lane.b32.xlu1 %v4854_v62, %s4858_s13 }
 0x246   :  { %2861 = vrot.lane.b32.xlu0 %v5180_v2, %s4857_s1  ;;  %1572 = vrot.lane.b32.xlu1 %v5138_v33, %s4858_s13 }
 0x248   :  { %v1109_v44 = vpop.permute.xlu0 %1108 }
 0x24a   :  { %1566 = vrot.lane.b32.xlu0 %v5146_v50, %s4858_s13  ;;  %3019 = vrot.lane.b32.xlu1 %v5148_v51, %s4858_s13 }
 0x24e   :  { %3021 = vrot.lane.b32.xlu0 %v5174_v23, %s4858_s13  ;;  %2869 = vrot.lane.b32.xlu1 %v5192_v38, %s4857_s1 }
 0x252   :  { %1574 = vrot.lane.b32.xlu0 %v5154_v3, %s4858_s13  ;;  %4647 = vrot.lane.b32.xlu1 %v4854_v62, %s4858_s13 }
 0x256   :  { %3029 = vrot.lane.b32.xlu0 %v5186_v37, %s4858_s13  ;;  %3027 = vrot.lane.b32.xlu1 %v5156_v4, %s4858_s13 }
 0x25a   :  { %1879 = vrot.lane.b32.xlu0 %v5146_v50, %s4846_s29  ;;  %3023 = vrot.lane.b32.xlu1 %v5180_v2, %s4858_s13 }
 0x25e   :  { %3031 = vrot.lane.b32.xlu0 %v5192_v38, %s4858_s13  ;;  %1877 = vrot.lane.b32.xlu1 %v5132_v20, %s4846_s29 }
 0x262   :  { %1885 = vrot.lane.b32.xlu0 %v5138_v33, %s4846_s29  ;;  %1875 = vrot.lane.b32.xlu1 %v5130_v19, %s4846_s29 }
 0x266   :  { %1883 = vrot.lane.b32.xlu0 %v5136_v32, %s4846_s29  ;;  %1887 = vrot.lane.b32.xlu1 %v5154_v3, %s4846_s29 }
 0x268   :  { %v1103_v42 = vpop.permute.xlu1 %1102 }
 0x26a   :  { %3331 = vrot.lane.b32.xlu0 %v5174_v23, %s4846_s29  ;;  %4652 = vrot.lane.b32.xlu1 %v4854_v62, %s4846_s29 }
 0x26c   :  { %v1101_v45 = vpop.permute.xlu1 %1100 }
 0x26d   :  { %v1114_v46 = vsel %vm1112_vm10, %v1099_v41, %v1101_v45  ;;  %v1115_v56 = vsel %vm1112_vm10, %v1101_v45, %v1103_v42 }
 0x26e   :  { %1132 = vmatprep.subr.bf16.mxu1 %v1114_v46  ;;  %3329 = vrot.lane.b32.xlu0 %v5148_v51, %s4846_s29 }
 0x26f   :  { %3333 = vrot.lane.b32.xlu1 %v5180_v2, %s4846_s29  ;;  %1133 = vmatpush1.bf16.msra.mxu1 %v1113_v47 }
 0x270   :  { %v1107_v49 = vpop.permute.xlu1 %1106  ;;  %v1111_v52 = vpop.permute.xlu0 %1110 }
 0x271   :  { %v1117_v53 = vsel %vm1112_vm10, %v1107_v49, %v1109_v44  ;;  %v1116_v54 = vsel %vm1112_vm10, %v4620_v48, %v1107_v49  ;;  %v1118_v59 = vsel %vm1112_vm10, %v1109_v44, %v1111_v52 }
 0x272   :  { %1134 = vmatprep.subr.bf16.mxu1 %v1117_v53  ;;  %2040 = vrot.lane.b32.xlu0 %v5132_v20, %s4859_s14  ;;  %v4712_v53 = vld [vmem:[#allocation9] sm:$0xff]  }
 0x273   :  { %3339 = vrot.lane.b32.xlu1 %v5186_v37, %s4846_s29  ;;  %1135 = vmatpush1.bf16.msra.mxu1 %v1116_v54 }
 0x274   :  { %v1247_v57 = vpop.permute.xlu1 %1246  ;;  %4254 = vmatprep.subr.bf16.mxu1 %v1115_v56  ;;  %v1249_v58 = vpop.permute.xlu0 %1248 }
 0x275   :  { %v1262_v1 = vsel %vm1260_vm11, %v1247_v57, %v1249_v58 }
 0x276   :  { %4076 = vmatmul.mubr.msk.bf16.vlgmr.msra.gmra.mrb[8].mxu1 %vm1125_vm9, %v4706_v55  ;;  %2038 = vrot.lane.b32.xlu0 %v5130_v19, %s4859_s14 }
 0x277   :  { %3337 = vrot.lane.b32.xlu1 %v5156_v4, %s4846_s29  ;;  %4255 = vmatpush3.bf16.msra.mxu1 %v1115_v56 }
 0x278   :  { %v4623_v60 = vpop.permute.xlu1 %4622  ;;  %4256 = vmatprep.subr.bf16.mxu1 %v1118_v59  ;;  %v1255_v61 = vpop.permute.xlu0 %1254  ;;  %1174 = vmatprep.mubr.bf16.mxu1 %v4854_v62 }
 0x279   :  { %v4624_v11 = vunpack.i.l.bf16 %v4623_v60  ;;  %v4625_v15 = vunpack.i.h.bf16 %v4623_v60  ;;  %v4713_v60 = vld [vmem:[#allocation9 + $0x20] sm:$0xff]  }
 0x27a   :  { %2050 = vrot.lane.b32.xlu0 %v5154_v3, %s4859_s14 }
 0x27b   :  { %2042 = vrot.lane.b32.xlu1 %v5146_v50, %s4859_s14  ;;  %4257 = vmatpush3.bf16.msra.mxu1 %v1118_v59  ;;  %v1261_v16 = vsel %vm1260_vm11, %v4624_v11, %v1247_v57  ;;  %v1264_v0 = vsel %vm1260_vm11, %v4625_v15, %v1255_v61  ;;  %v4715_v11 = vld [vmem:[#allocation9 + $0x28] sm:$0xff]  }
 0x27c   :  { %v5280_v6 = vpop.permute.xlu1 %2707  ;;  %1279 = vmatprep.subr.bf16.mxu1 %v1262_v1  ;;  %v1251_v8 = vpop.permute.xlu0 %1250  ;;  %v4714_v1 = vld [vmem:[#allocation9 + $0x8] sm:$0xff]  }
 0x27d   :  { %v1263_v21 = vsel %vm1260_vm11, %v1249_v58, %v1251_v8 }
 0x27e   :  { %4077 = vmatmul.mubr.msk.bf16.gmra.mrb[12].mxu1 %vm1125_vm9, %v4707_v63  ;;  %3341 = vrot.lane.b32.xlu0 %v5192_v38, %s4846_s29 }
 0x27f   :  { %2048 = vrot.lane.b32.xlu1 %v5138_v33, %s4859_s14  ;;  %4258 = vmatprep.mubr.msk.bf16.mxu1 %vm1125_vm9, %v4706_v55 }
 0x280   :  { %v5288_v9 = vpop.permute.xlu1 %4627  ;;  %v1259_v10 = vpop.permute.xlu0 %1258 }
 0x281   :  { %v4629_v30 = vunpack.i.l.bf16 %v5288_v9  ;;  %v4630_v44 = vunpack.i.h.bf16 %v5288_v9 }
 0x282   :  { %4657 = vrot.lane.b32.xlu0 %v4854_v62, %s4846_s29 }
 0x283   :  { %2046 = vrot.lane.b32.xlu1 %v5136_v32, %s4859_s14  ;;  %v2721_v40 = vsel %vm1260_vm11, %v4629_v30, %v5280_v6 }
 0x284   :  { %v1257_v12 = vpop.permute.xlu1 %1256  ;;  %v5294_v13 = vpop.permute.xlu0 %2563 }
 0x285   :  { %v1265_v14 = vsel %vm1260_vm11, %v1255_v61, %v1257_v12  ;;  %v1266_v7 = vsel %vm1260_vm11, %v1257_v12, %v1259_v10 }
 0x286   :  { %4259 = vmatmul.mubr.msk.bf16.vlgmr.msra.gmra.mrb[16].mxu1 %vm1125_vm9, %v4707_v63  ;;  %3493 = vrot.lane.b32.xlu0 %v5174_v23, %s4859_s14 }
 0x287   :  { %1280 = vmatpush1.bf16.msra.mxu1 %v1261_v16  ;;  %4662 = vrot.lane.b32.xlu1 %v4854_v62, %s4859_s14 }
 0x288   :  { %1281 = vmatprep.subr.bf16.mxu1 %v1265_v14  ;;  %v2716_v17 = vpop.permute.xlu1 %2715  ;;  %v2710_v5 = vpop.permute.xlu0 %2709  ;;  %1311 = vmatprep.mubr.bf16.mxu1 %v4854_v62 }
 0x289   :  { %v2722_v36 = vsel %vm1260_vm11, %v5280_v6, %v2710_v5  ;;  %v2724_v46 = vsel %vm1260_vm11, %v4630_v44, %v2716_v17 }
 0x28a   :  { %3491 = vrot.lane.b32.xlu0 %v5148_v51, %s4859_s14 }
 0x28b   :  { %1282 = vmatpush1.bf16.msra.mxu1 %v1264_v0  ;;  %3495 = vrot.lane.b32.xlu1 %v5180_v2, %s4859_s14 }
 0x28c   :  { %4262 = vmatprep.subr.bf16.mxu1 %v1263_v21  ;;  %v2566_v22 = vpop.permute.xlu1 %2565  ;;  %v5310_v24 = vpop.permute.xlu0 %2571 }
 0x28d   :  { %v2577_v25 = vsel %vm1112_vm10, %v5294_v13, %v2566_v22 }
 0x28e   :  { %4082 = vmatmul.mubr.msk.bf16.vlgmr.msra.gmra.mrb[8].mxu1 %vm1125_vm9, %v4708_v18  ;;  %4326 = vmatprep.subr.bf16.mxu0 %v2577_v25 }
 0x28f   :  { %4263 = vmatpush3.bf16.msra.mxu1 %v1263_v21  ;;  %2204 = vrot.lane.b32.xlu0 %v5132_v20, %s4848_s30 }
 0x290   :  { %3501 = vrot.lane.b32.xlu1 %v5186_v37, %s4859_s14  ;;  %4264 = vmatprep.subr.bf16.mxu1 %v1266_v7  ;;  %v5320_v26 = vpop.permute.xlu0 %2717  ;;  %v2574_v27 = vpop.permute.xlu1 %2573 }
 0x291   :  { %4327 = vmatpush3.bf16.msra.mxu0 %v2577_v25  ;;  %v2580_v28 = vsel %vm1112_vm10, %v5310_v24, %v2574_v27  ;;  %1321 = vmatprep.mubr.bf16.mxu1 %v4854_v62  ;;  %v2725_v43 = vsel %vm1260_vm11, %v2716_v17, %v5320_v26 }
 0x292   :  { %4328 = vmatprep.subr.bf16.mxu0 %v2580_v28 }
 0x293   :  { %4265 = vmatpush3.bf16.msra.mxu1 %v1266_v7  ;;  %2202 = vrot.lane.b32.xlu0 %v5130_v19, %s4848_s30 }
 0x294   :  { %3499 = vrot.lane.b32.xlu1 %v5156_v4, %s4859_s14  ;;  %v1401_v31 = vpop.permute.xlu0 %1400  ;;  %v1399_v34 = vpop.permute.xlu1 %1398 }
 0x295   :  { %4329 = vmatpush3.bf16.msra.mxu0 %v2580_v28  ;;  %v1414_v39 = vsel %vm1412_vm12, %v1399_v34, %v1401_v31  ;;  %v4716_v28 = vld [vmem:[#allocation9 + $0x20] sm:$0xff]  }
 0x296   :  { %2739 = vmatprep.subr.bf16.mxu0 %v2722_v36  ;;  %4083 = vmatmul.mubr.msk.bf16.gmra.mrb[12].mxu1 %vm1125_vm9, %v4709_v29 }
 0x297   :  { %3503 = vrot.lane.b32.xlu0 %v5192_v38, %s4859_s14  ;;  %1431 = vmatprep.subr.bf16.mxu1 %v1414_v39 }
 0x298   :  { %2206 = vrot.lane.b32.xlu1 %v5146_v50, %s4848_s30  ;;  %4331 = vmatmul.mubr.msk.bf16.vlgmr.msra.gmra.mrb[16].mxu0 %vm1125_vm9, %v5330_v35  ;;  %v1407_v41 = vpop.permute.xlu0 %1406  ;;  %v4633_v42 = vpop.permute.xlu1 %4632 }
 0x299   :  { %2740 = vmatpush1.bf16.msra.mxu0 %v2721_v40  ;;  %4266 = vmatprep.mubr.msk.bf16.mxu1 %vm1125_vm9, %v4708_v18  ;;  %v4634_v45 = vunpack.i.l.bf16 %v4633_v42  ;;  %v4635_v54 = vunpack.i.h.bf16 %v4633_v42 }
 0x29a   :  { %2741 = vmatprep.subr.bf16.mxu0 %v2725_v43  ;;  %2771 = vmatprep.mubr.bf16.mxu0 %v4854_v62 }
 0x29b   :  { %2214 = vrot.lane.b32.xlu0 %v5154_v3, %s4848_s30  ;;  %v1413_v55 = vsel %vm1412_vm12, %v4634_v45, %v1399_v34  ;;  %v1416_v59 = vsel %vm1412_vm12, %v4635_v54, %v1407_v41  ;;  %v4718_v45 = vld [vmem:[#allocation9 + $0x28] sm:$0xff]  }
 0x29c   :  { %2212 = vrot.lane.b32.xlu1 %v5138_v33, %s4848_s30  ;;  %v2712_v47 = vpop.permute.xlu0 %2711  ;;  %v1409_v48 = vpop.permute.xlu1 %1408 }
 0x29d   :  { %2742 = vmatpush1.bf16.msra.mxu0 %v2724_v46  ;;  %v2723_v49 = vsel %vm1260_vm11, %v2710_v5, %v2712_v47  ;;  %v1417_v52 = vsel %vm1412_vm12, %v1407_v41, %v1409_v48  ;;  %v4717_v41 = vld [vmem:[#allocation9 + $0x30] sm:$0xff]  }
 0x29e   :  { %4267 = vmatmul.mubr.msk.bf16.vlgmr.msra.gmra.mrb[16].mxu1 %vm1125_vm9, %v4709_v29  ;;  %4334 = vmatprep.subr.bf16.mxu0 %v2723_v49 }
 0x29f   :  { %4667 = vrot.lane.b32.xlu0 %v4854_v62, %s4859_s14  ;;  %1432 = vmatpush1.bf16.msra.mxu1 %v1413_v55 }
 0x2a0   :  { %2210 = vrot.lane.b32.xlu1 %v5136_v32, %s4848_s30  ;;  %1433 = vmatprep.subr.bf16.mxu1 %v1417_v52  ;;  %v1403_v56 = vpop.permute.xlu0 %1402  ;;  %v2858_v57 = vpop.permute.xlu1 %2857  ;;  %v4719_v52 = vld [vmem:[#allocation9 + $0x38] sm:$0xff]  }
 0x2a1   :  { %4136 = vmatmul.mubr.msk.bf16.vlgmr.msra.gmra.mrb[20].mxu0 %vm1125_vm9, %v4712_v53  ;;  %v1415_v58 = vsel %vm1412_vm12, %v1401_v31, %v1403_v56  ;;  %1463 = vmatprep.mubr.bf16.mxu1 %v4854_v62 }
 0x2a2   :  { %4335 = vmatpush3.bf16.msra.mxu0 %v2723_v49  ;;  %2781 = vmatprep.mubr.bf16.mxu0 %v4854_v62 }
 0x2a3   :  { %3655 = vrot.lane.b32.xlu0 %v5174_v23, %s4848_s30  ;;  %1434 = vmatpush1.bf16.msra.mxu1 %v1416_v59 }
 0x2a4   :  { %4672 = vrot.lane.b32.xlu1 %v4854_v62, %s4848_s30  ;;  %4270 = vmatprep.subr.bf16.mxu1 %v1415_v58  ;;  %v2860_v61 = vpop.permute.xlu0 %2859  ;;  %v4638_v63 = vpop.permute.xlu1 %4637 }
 0x2a5   :  { %v2872_v14 = vsel %vm1412_vm12, %v2858_v57, %v2860_v61  ;;  %v4639_v16 = vunpack.i.l.bf16 %v4638_v63  ;;  %v4640_v22 = vunpack.i.h.bf16 %v4638_v63 }
 0x2a6   :  { %4088 = vmatmul.mubr.msk.bf16.vlgmr.msra.gmra.mrb[8].mxu1 %vm1125_vm9, %v4713_v60 }
 0x2a7   :  { %3653 = vrot.lane.b32.xlu0 %v5148_v51, %s4848_s30  ;;  %4271 = vmatpush3.bf16.msra.mxu1 %v1415_v58  ;;  %v2871_v0 = vsel %vm1412_vm12, %v4639_v16, %v2858_v57 }
 0x2a8   :  { %3657 = vrot.lane.b32.xlu1 %v5180_v2, %s4848_s30  ;;  %v1411_v6 = vpop.permute.xlu0 %1410  ;;  %v2720_v8 = vpop.permute.xlu1 %2719  ;;  %1473 = vmatprep.mubr.bf16.mxu1 %v4854_v62 }
 0x2a9   :  { %4137 = vmatmul.mubr.msk.bf16.gmra.mrb[24].mxu0 %vm1125_vm9, %v4714_v1  ;;  %v1418_v9 = vsel %vm1412_vm12, %v1409_v48, %v1411_v6  ;;  %v2726_v10 = vsel %vm1260_vm11, %v5320_v26, %v2720_v8  ;;  %v4720_v8 = vld [vmem:[#allocation9 + $0x30] sm:$0xff]  }
 0x2aa   :  { %4272 = vmatprep.subr.bf16.mxu1 %v1418_v9  ;;  %4336 = vmatprep.subr.bf16.mxu0 %v2726_v10 }
 0x2ab   :  { %2367 = vrot.lane.b32.xlu0 %v5132_v20, %s4849_s5  ;;  %4273 = vmatpush3.bf16.msra.mxu1 %v1418_v9 }
 0x2ac   :  { %3663 = vrot.lane.b32.xlu1 %v5186_v37, %s4848_s30  ;;  %4337 = vmatpush3.bf16.msra.mxu0 %v2726_v10  ;;  %v5385_v12 = vpop.permute.xlu0 %2867  ;;  %v2866_v15 = vpop.permute.xlu1 %2865 }
 0x2ad   :  { %2889 = vmatprep.subr.bf16.mxu0 %v2872_v14  ;;  %4338 = vmatprep.mubr.msk.bf16.mxu0 %vm1125_vm9, %v4712_v53  ;;  %v2875_v21 = vsel %vm1412_vm12, %v2866_v15, %v5385_v12  ;;  %v2874_v26 = vsel %vm1412_vm12, %v4640_v22, %v2866_v15  ;;  %v4721_v15 = vld [vmem:[#allocation9 + $0x40] sm:$0xff]  }
 0x2ae   :  { %4089 = vmatmul.mubr.msk.bf16.gmra.mrb[12].mxu1 %vm1125_vm9, %v4715_v11 }
 0x2af   :  { %3665 = vrot.lane.b32.xlu0 %v5192_v38, %s4848_s30  ;;  %4274 = vmatprep.mubr.msk.bf16.mxu1 %vm1125_vm9, %v4713_v60 }
 0x2b0   :  { %3661 = vrot.lane.b32.xlu1 %v5156_v4, %s4848_s30  ;;  %v1565_v17 = vpop.permute.xlu0 %1564  ;;  %v1563_v5 = vpop.permute.xlu1 %1562 }
 0x2b1   :  { %4339 = vmatmul.mubr.msk.bf16.vlgmr.msra.gmra.mrb[16].mxu0 %vm1125_vm9, %v4714_v1  ;;  %v1578_v18 = vsel %vm1576_vm13, %v1563_v5, %v1565_v17 }
 0x2b2   :  { %2890 = vmatpush1.bf16.msra.mxu0 %v2871_v0  ;;  %1595 = vmatprep.subr.bf16.mxu1 %v1578_v18 }
 0x2b3   :  { %2891 = vmatprep.subr.bf16.mxu0 %v2875_v21  ;;  %2365 = vrot.lane.b32.xlu0 %v5130_v19, %s4849_s5  ;;  %v4724_v21 = vld [vmem:[#allocation9 + $0x40] sm:$0xff]  }
 0x2b4   :  { %2369 = vrot.lane.b32.xlu1 %v5146_v50, %s4849_s5  ;;  %v1571_v25 = vpop.permute.xlu0 %1570  ;;  %v4643_v7 = vpop.permute.xlu1 %4642  ;;  %2921 = vmatprep.mubr.bf16.mxu0 %v4854_v62 }
 0x2b5   :  { %v4644_v27 = vunpack.i.l.bf16 %v4643_v7  ;;  %v4645_v29 = vunpack.i.h.bf16 %v4643_v7 }
 0x2b6   :  { %2892 = vmatpush1.bf16.msra.mxu0 %v2874_v26  ;;  %4275 = vmatmul.mubr.msk.bf16.vlgmr.msra.gmra.mrb[16].mxu1 %vm1125_vm9, %v4715_v11 }
 0x2b7   :  { %2377 = vrot.lane.b32.xlu0 %v5154_v3, %s4849_s5  ;;  %v1577_v30 = vsel %vm1576_vm13, %v4644_v27, %v1563_v5  ;;  %1627 = vmatprep.mubr.bf16.mxu1 %v4854_v62  ;;  %v1580_v40 = vsel %vm1576_vm13, %v4645_v29, %v1571_v25  ;;  %v4725_v27 = vld [vmem:[#allocation9 + $0x50] sm:$0xff]  }
 0x2b8   :  { %2375 = vrot.lane.b32.xlu1 %v5138_v33, %s4849_s5  ;;  %v2862_v31 = vpop.permute.xlu0 %2861  ;;  %v1573_v34 = vpop.permute.xlu1 %1572  ;;  %1596 = vmatpush1.bf16.msra.mxu1 %v1577_v30 }
 0x2b9   :  { %4142 = vmatmul.mubr.msk.bf16.vlgmr.msra.gmra.mrb[20].mxu0 %vm1125_vm9, %v4716_v28  ;;  %v1581_v36 = vsel %vm1576_vm13, %v1571_v25, %v1573_v34  ;;  %v2873_v39 = vsel %vm1412_vm12, %v2860_v61, %v2862_v31  ;;  %v4726_v31 = vld [vmem:[#allocation9 + $0x48] sm:$0xff]  }
 0x2ba   :  { %1597 = vmatprep.subr.bf16.mxu1 %v1581_v36  ;;  %4342 = vmatprep.subr.bf16.mxu0 %v2873_v39 }
 0x2bb   :  { %4677 = vrot.lane.b32.xlu0 %v4854_v62, %s4848_s30  ;;  %4343 = vmatpush3.bf16.msra.mxu0 %v2873_v39 }
 0x2bc   :  { %2373 = vrot.lane.b32.xlu1 %v5136_v32, %s4849_s5  ;;  %v1567_v42 = vpop.permute.xlu0 %1566  ;;  %v3020_v43 = vpop.permute.xlu1 %3019  ;;  %1598 = vmatpush1.bf16.msra.mxu1 %v1580_v40  ;;  %v4727_v40 = vld [vmem:[#allocation9 + $0x58] sm:$0xff]  }
 0x2bd   :  { %v1579_v44 = vsel %vm1576_vm13, %v1565_v17, %v1567_v42  ;;  %2931 = vmatprep.mubr.bf16.mxu0 %v4854_v62  ;;  %v4723_v17 = vld [vmem:[#allocation9 + $0x48] sm:$0xff]  }
 0x2be   :  { %4278 = vmatprep.subr.bf16.mxu1 %v1579_v44 }
 0x2bf   :  { %3817 = vrot.lane.b32.xlu0 %v5174_v23, %s4849_s5  ;;  %4094 = vmatmul.mubr.msk.bf16.vlgmr.msra.gmra.mrb[8].mxu1 %vm1125_vm9, %v4717_v41 }
 0x2c0   :  { %4682 = vrot.lane.b32.xlu1 %v4854_v62, %s4849_s5  ;;  %v3022_v46 = vpop.permute.xlu0 %3021  ;;  %v2870_v47 = vpop.permute.xlu1 %2869  ;;  %4279 = vmatpush3.bf16.msra.mxu1 %v1579_v44 }
 0x2c1   :  { %4143 = vmatmul.mubr.msk.bf16.gmra.mrb[24].mxu0 %vm1125_vm9, %v4718_v45  ;;  %v2876_v48 = vsel %vm1412_vm12, %v5385_v12, %v2870_v47  ;;  %1637 = vmatprep.mubr.bf16.mxu1 %v4854_v62  ;;  %v3034_v49 = vsel %vm1576_vm13, %v3020_v43, %v3022_v46 }
 0x2c2   :  { %4344 = vmatprep.subr.bf16.mxu0 %v2876_v48  ;;  %4346 = vmatprep.mubr.msk.bf16.mxu0 %vm1125_vm9, %v4716_v28 }
 0x2c3   :  { %3815 = vrot.lane.b32.xlu0 %v5148_v51, %s4849_s5  ;;  %4345 = vmatpush3.bf16.msra.mxu0 %v2876_v48 }
 0x2c4   :  { %3819 = vrot.lane.b32.xlu1 %v5180_v2, %s4849_s5  ;;  %v1575_v53 = vpop.permute.xlu0 %1574  ;;  %v4648_v54 = vpop.permute.xlu1 %4647  ;;  %3051 = vmatprep.subr.bf16.mxu0 %v3034_v49 }
 0x2c5   :  { %v4649_v55 = vunpack.i.l.bf16 %v4648_v54  ;;  %v1582_v56 = vsel %vm1576_vm13, %v1573_v34, %v1575_v53  ;;  %v4650_v60 = vunpack.i.h.bf16 %v4648_v54  ;;  %v4728_v53 = vld [vmem:[#allocation9 + $0x50] sm:$0xff]  }
 0x2c6   :  { %4280 = vmatprep.subr.bf16.mxu1 %v1582_v56 }
 0x2c7   :  { %3827 = vrot.lane.b32.xlu0 %v5192_v38, %s4849_s5  ;;  %4095 = vmatmul.mubr.msk.bf16.gmra.mrb[12].mxu1 %vm1125_vm9, %v4719_v52  ;;  %v3033_v57 = vsel %vm1576_vm13, %v4649_v55, %v3020_v43 }
 0x2c8   :  { %3825 = vrot.lane.b32.xlu1 %v5186_v37, %s4849_s5  ;;  %4281 = vmatpush3.bf16.msra.mxu1 %v1582_v56  ;;  %v3030_v58 = vpop.permute.xlu0 %3029  ;;  %v3028_v59 = vpop.permute.xlu1 %3027 }
 0x2c9   :  { %4347 = vmatmul.mubr.msk.bf16.vlgmr.msra.gmra.mrb[16].mxu0 %vm1125_vm9, %v4718_v45  ;;  %1730 = vmatprep.subr.bf16.mxu1 %v5132_v20  ;;  %v3037_v61 = vsel %vm1576_vm13, %v3028_v59, %v3030_v58  ;;  %v3036_v6 = vsel %vm1576_vm13, %v4650_v60, %v3028_v59 }
 0x2ca   :  { %3052 = vmatpush1.bf16.msra.mxu0 %v3033_v57  ;;  %4282 = vmatprep.mubr.msk.bf16.mxu1 %vm1125_vm9, %v4717_v41 }
 0x2cb   :  { %2561 = vrot.lane.b32.xlu0 %v5148_v51, %s4855_s10  ;;  %3053 = vmatprep.subr.bf16.mxu0 %v3037_v61 }
 0x2cc   :  { %3823 = vrot.lane.b32.xlu1 %v5156_v4, %s4849_s5  ;;  %v5453_v63 = vpop.permute.xlu0 %1879  ;;  %v3024_v1 = vpop.permute.xlu1 %3023  ;;  %3083 = vmatprep.mubr.bf16.mxu0 %v4854_v62 }
 0x2cd   :  { %v3035_v20 = vsel %vm1576_vm13, %v3022_v46, %v3024_v1  ;;  %v4729_v1 = vld [vmem:[#allocation9 + $0x60] sm:$0xff]  }
 0x2ce   :  { %3054 = vmatpush1.bf16.msra.mxu0 %v3036_v6 }
 0x2cf   :  { %2569 = vrot.lane.b32.xlu0 %v5156_v4, %s4855_s10  ;;  %4350 = vmatprep.subr.bf16.mxu0 %v3035_v20 }
 0x2d0   :  { %2559 = vrot.lane.b32.xlu1 %v4854_v62, %s4855_s10  ;;  %4283 = vmatmul.mubr.msk.bf16.vlgmr.msra.gmra.mrb[16].mxu1 %vm1125_vm9, %v4719_v52  ;;  %v3032_v9 = vpop.permute.xlu0 %3031  ;;  %v1878_v10 = vpop.permute.xlu1 %1877 }
 0x2d1   :  { %1731 = vmatpush1.bf16.msra.mxu1 %v5130_v19  ;;  %4148 = vmatmul.mubr.msk.bf16.vlgmr.msra.gmra.mrb[20].mxu0 %vm1125_vm9, %v4720_v8  ;;  %v3038_v11 = vsel %vm1576_vm13, %v3030_v58, %v3032_v9  ;;  %v4722_v19 = vld [vmem:[#allocation9 + $0x38] sm:$0xff]   ;;  %v1892_v5 = vsel %vm111_vm1, %v1878_v10, %v5453_v63 }
 0x2d2   :  { %1732 = vmatprep.subr.bf16.mxu1 %v5138_v33  ;;  %4351 = vmatpush3.bf16.msra.mxu0 %v3035_v20  ;;  %v4730_v9 = vld [vmem:[#allocation9 + $0x58] sm:$0xff]  }
 0x2d3   :  { %3821 = vrot.lane.b32.xlu0 %v4854_v62, %s4849_s5  ;;  %4352 = vmatprep.subr.bf16.mxu0 %v3038_v11 }
 0x2d4   :  { %2567 = vrot.lane.b32.xlu1 %v4854_v62, %s4855_s10  ;;  %v1886_v12 = vpop.permute.xlu0 %1885  ;;  %v1876_v14 = vpop.permute.xlu1 %1875  ;;  %1762 = vmatprep.mubr.bf16.mxu1 %v4854_v62 }
 0x2d5   :  { %1733 = vmatpush1.bf16.msra.mxu1 %v5136_v32  ;;  %3093 = vmatprep.mubr.bf16.mxu0 %v4854_v62  ;;  %v1891_v22 = vsel %vm111_vm1, %v1876_v14, %v1878_v10 }
 0x2d6   :  { %4286 = vmatprep.subr.bf16.mxu1 %v5146_v50  ;;  %4353 = vmatpush3.bf16.msra.mxu0 %v3038_v11 }
 0x2d7   :  { %3185 = vmatprep.subr.bf16.mxu0 %v5174_v23 }
 0x2d8   :  { %3829 = vrot.lane.b32.xlu1 %v4854_v62, %s4849_s5  ;;  %4100 = vmatmul.mubr.msk.bf16.vlgmr.msra.gmra.mrb[8].mxu1 %vm1125_vm9, %v4721_v15  ;;  %v1884_v33 = vpop.permute.xlu0 %1883  ;;  %v1888_v16 = vpop.permute.xlu1 %1887 }
 0x2d9   :  { %4287 = vmatpush3.bf16.msra.mxu1 %v5146_v50  ;;  %4149 = vmatmul.mubr.msk.bf16.gmra.mrb[24].mxu0 %vm1125_vm9, %v4722_v19 }
 0x2da   :  { %4288 = vmatprep.subr.bf16.mxu1 %v5154_v3  ;;  %1772 = vmatprep.mubr.bf16.mxu1 %v4854_v62 }
 0x2db   :  { %4354 = vmatprep.mubr.msk.bf16.mxu0 %vm1125_vm9, %v4720_v8 }
 0x2dc   :  { %v5484_v32 = vpop.permute.xlu0 %3331  ;;  %v4653_v23 = vpop.permute.xlu1 %4652 }
 0x2dd   :  { %4289 = vmatpush3.bf16.msra.mxu1 %v5154_v3  ;;  %v4654_v7 = vunpack.i.l.bf16 %v4653_v23  ;;  %v4655_v28 = vunpack.i.h.bf16 %v4653_v23 }
 0x2de   :  { %1909 = vmatprep.subr.bf16.mxu1 %v1892_v5 }
 0x2df   :  { %v1893_v30 = vsel %vm111_vm1, %v5453_v63, %v4654_v7  ;;  %v1896_v39 = vsel %vm111_vm1, %v1888_v16, %v4655_v28 }
 0x2e0   :  { %4101 = vmatmul.mubr.msk.bf16.gmra.mrb[12].mxu1 %vm1125_vm9, %v4723_v17  ;;  %v3330_v50 = vpop.permute.xlu0 %3329 }
 0x2e1   :  { %4355 = vmatmul.mubr.msk.bf16.vlgmr.msra.gmra.mrb[16].mxu0 %vm1125_vm9, %v4722_v19  ;;  %v5491_v0 = vpop.permute.xlu1 %3333  ;;  %4290 = vmatprep.mubr.msk.bf16.mxu1 %vm1125_vm9, %v4721_v15  ;;  %v3345_v44 = vsel %vm111_vm1, %v3330_v50, %v5484_v32  ;;  %v4731_v19 = vld [vmem:[#allocation9 + $0x68] sm:$0xff]  }
 0x2e2   :  { %3186 = vmatpush1.bf16.msra.mxu0 %v5148_v51  ;;  %3217 = vmatprep.mubr.bf16.mxu0 %v4854_v62 }
 0x2e3   :  { %3187 = vmatprep.subr.bf16.mxu0 %v5186_v37  ;;  %v1895_v37 = vsel %vm111_vm1, %v1886_v12, %v1888_v16 }
 0x2e4   :  { %v5497_v3 = vpop.permute.xlu0 %2040 }
 0x2e5   :  { %v3340_v18 = vpop.permute.xlu1 %3339 }
 0x2e6   :  { %3188 = vmatpush1.bf16.msra.mxu0 %v5156_v4  ;;  %v1894_v4 = vsel %vm111_vm1, %v1884_v33, %v1886_v12 }
 0x2e7   :  { %4358 = vmatprep.subr.bf16.mxu0 %v5180_v2 }
 0x2e8   :  { %4291 = vmatmul.mubr.msk.bf16.vlgmr.msra.gmra.mrb[16].mxu1 %vm1125_vm9, %v4723_v17  ;;  %v2039_v25 = vpop.permute.xlu0 %2038 }
 0x2e9   :  { %1910 = vmatpush1.bf16.msra.mxu1 %v1891_v22  ;;  %4154 = vmatmul.mubr.msk.bf16.vlgmr.msra.gmra.mrb[20].mxu0 %vm1125_vm9, %v4724_v21  ;;  %v3338_v51 = vpop.permute.xlu1 %3337  ;;  %v2055_v56 = vsel %vm2054_vm14, %v2039_v25, %v5497_v3  ;;  %v4732_v22 = vld [vmem:[#allocation9 + $0x60] sm:$0xff]  }
 0x2ea   :  { %4359 = vmatpush3.bf16.msra.mxu0 %v5180_v2  ;;  %1911 = vmatprep.subr.bf16.mxu1 %v1895_v37  ;;  %v3346_v2 = vsel %vm111_vm1, %v5484_v32, %v5491_v0  ;;  %v3348_v49 = vsel %vm111_vm1, %v3338_v51, %v3340_v18 }
 0x2eb   :  { %4360 = vmatprep.subr.bf16.mxu0 %v5192_v38  ;;  %1941 = vmatprep.mubr.bf16.mxu1 %v4854_v62 }
 0x2ec   :  { %v5509_v26 = vpop.permute.xlu0 %2050  ;;  %3227 = vmatprep.mubr.bf16.mxu0 %v4854_v62 }
 0x2ed   :  { %1912 = vmatpush1.bf16.msra.mxu1 %v1894_v4  ;;  %v2043_v29 = vpop.permute.xlu1 %2042 }
 0x2ee   :  { %4361 = vmatpush3.bf16.msra.mxu0 %v5192_v38  ;;  %4294 = vmatprep.subr.bf16.mxu1 %v1893_v30  ;;  %v2056_v42 = vsel %vm2054_vm14, %v5497_v3, %v2043_v29 }
 0x2ef   :  { %3363 = vmatprep.subr.bf16.mxu0 %v3346_v2 }
 0x2f0   :  { %4106 = vmatmul.mubr.msk.bf16.vlgmr.msra.gmra.mrb[8].mxu1 %vm1125_vm9, %v4725_v27  ;;  %v3342_v34 = vpop.permute.xlu0 %3341 }
 0x2f1   :  { %4295 = vmatpush3.bf16.msra.mxu1 %v1893_v30  ;;  %4155 = vmatmul.mubr.msk.bf16.gmra.mrb[24].mxu0 %vm1125_vm9, %v4726_v31  ;;  %v2049_v36 = vpop.permute.xlu1 %2048  ;;  %v3349_v47 = vsel %vm111_vm1, %v3340_v18, %v3342_v34  ;;  %v4733_v30 = vld [vmem:[#allocation9 + $0x70] sm:$0xff]  }
 0x2f2   :  { %4296 = vmatprep.subr.bf16.mxu1 %v1896_v39  ;;  %1951 = vmatprep.mubr.bf16.mxu1 %v4854_v62  ;;  %v2059_v59 = vsel %vm2054_vm14, %v2049_v36, %v5509_v26 }
 0x2f3   :  { %4362 = vmatprep.mubr.msk.bf16.mxu0 %vm1125_vm9, %v4724_v21 }
 0x2f4   :  { %v4658_v38 = vpop.permute.xlu0 %4657 }
 0x2f5   :  { %4297 = vmatpush3.bf16.msra.mxu1 %v1896_v39  ;;  %v2047_v41 = vpop.permute.xlu1 %2046  ;;  %v4659_v46 = vunpack.i.l.bf16 %v4658_v38  ;;  %v4660_v54 = vunpack.i.h.bf16 %v4658_v38 }
 0x2f6   :  { %2073 = vmatprep.subr.bf16.mxu1 %v2056_v42  ;;  %v2058_v63 = vsel %vm2054_vm14, %v2047_v41, %v2049_v36  ;;  %v4734_v36 = vld [vmem:[#allocation9 + $0x68] sm:$0xff]  }
 0x2f7   :  { %v3347_v55 = vsel %vm111_vm1, %v5491_v0, %v4659_v46  ;;  %v3350_v61 = vsel %vm111_vm1, %v3342_v34, %v4660_v54 }
 0x2f8   :  { %4107 = vmatmul.mubr.msk.bf16.gmra.mrb[12].mxu1 %vm1125_vm9, %v4727_v40  ;;  %v3494_v43 = vpop.permute.xlu0 %3493 }
 0x2f9   :  { %4363 = vmatmul.mubr.msk.bf16.vlgmr.msra.gmra.mrb[16].mxu0 %vm1125_vm9, %v4726_v31  ;;  %v4663_v45 = vpop.permute.xlu1 %4662  ;;  %4298 = vmatprep.mubr.msk.bf16.mxu1 %vm1125_vm9, %v4725_v27 }
 0x2fa   :  { %3364 = vmatpush1.bf16.msra.mxu0 %v3345_v44  ;;  %3395 = vmatprep.mubr.bf16.mxu0 %v4854_v62  ;;  %v4664_v57 = vunpack.i.l.bf16 %v4663_v45  ;;  %v4665_v6 = vunpack.i.h.bf16 %v4663_v45 }
 0x2fb   :  { %3365 = vmatprep.subr.bf16.mxu0 %v3349_v47 }
 0x2fc   :  { %v3492_v48 = vpop.permute.xlu0 %3491  ;;  %v2057_v8 = vsel %vm2054_vm14, %v2043_v29, %v4664_v57  ;;  %v2060_v14 = vsel %vm2054_vm14, %v5509_v26, %v4665_v6 }
 0x2fd   :  { %v3496_v52 = vpop.permute.xlu1 %3495  ;;  %v3507_v23 = vsel %vm2054_vm14, %v3492_v48, %v3494_v43 }
 0x2fe   :  { %3366 = vmatpush1.bf16.msra.mxu0 %v3348_v49  ;;  %v3508_v11 = vsel %vm2054_vm14, %v3494_v43, %v3496_v52  ;;  %v4735_v43 = vld [vmem:[#allocation9 + $0x78] sm:$0xff]  }
 0x2ff   :  { %4366 = vmatprep.subr.bf16.mxu0 %v3347_v55 }
 0x300   :  { %4299 = vmatmul.mubr.msk.bf16.vlgmr.msra.gmra.mrb[16].mxu1 %vm1125_vm9, %v4727_v40 }
 0x301   :  { %2074 = vmatpush1.bf16.msra.mxu1 %v2055_v56  ;;  %4160 = vmatmul.mubr.msk.bf16.vlgmr.msra.gmra.mrb[20].mxu0 %vm1125_vm9, %v4728_v53  ;;  %v2205_v58 = vpop.permute.xlu0 %2204 }
 0x302   :  { %4367 = vmatpush3.bf16.msra.mxu0 %v3347_v55  ;;  %v3502_v60 = vpop.permute.xlu1 %3501  ;;  %2075 = vmatprep.subr.bf16.mxu1 %v2059_v59  ;;  %v4736_v55 = vld [vmem:[#allocation9 + $0x70] sm:$0xff]  }
 0x303   :  { %4368 = vmatprep.subr.bf16.mxu0 %v3350_v61  ;;  %2105 = vmatprep.mubr.bf16.mxu1 %v4854_v62 }
 0x304   :  { %3405 = vmatprep.mubr.bf16.mxu0 %v4854_v62 }
 0x305   :  { %2076 = vmatpush1.bf16.msra.mxu1 %v2058_v63  ;;  %v2203_v20 = vpop.permute.xlu0 %2202 }
 0x306   :  { %4369 = vmatpush3.bf16.msra.mxu0 %v3350_v61  ;;  %v3500_v10 = vpop.permute.xlu1 %3499  ;;  %4302 = vmatprep.subr.bf16.mxu1 %v2057_v8  ;;  %v2218_v51 = vsel %vm187_vm3, %v2203_v20, %v2205_v58 }
 0x307   :  { %3525 = vmatprep.subr.bf16.mxu0 %v3508_v11  ;;  %v3510_v18 = vsel %vm2054_vm14, %v3500_v10, %v3502_v60 }
 0x308   :  { %4112 = vmatmul.mubr.msk.bf16.vlgmr.msra.gmra.mrb[8].mxu1 %vm1125_vm9, %v4729_v1 }
 0x309   :  { %4303 = vmatpush3.bf16.msra.mxu1 %v2057_v8  ;;  %4161 = vmatmul.mubr.msk.bf16.gmra.mrb[24].mxu0 %vm1125_vm9, %v4730_v9  ;;  %v3504_v12 = vpop.permute.xlu0 %3503 }
 0x30a   :  { %v2207_v15 = vpop.permute.xlu1 %2206  ;;  %4304 = vmatprep.subr.bf16.mxu1 %v2060_v14  ;;  %2115 = vmatprep.mubr.bf16.mxu1 %v4854_v62  ;;  %v3511_v0 = vsel %vm2054_vm14, %v3502_v60, %v3504_v12 }
 0x30b   :  { %4370 = vmatprep.mubr.msk.bf16.mxu0 %vm1125_vm9, %v4728_v53  ;;  %v2219_v16 = vsel %vm187_vm3, %v2205_v58, %v2207_v15 }
 0x30d   :  { %4305 = vmatpush3.bf16.msra.mxu1 %v2060_v14  ;;  %v2215_v33 = vpop.permute.xlu0 %2214  ;;  %v4738_v14 = vld [vmem:[#allocation9 + $0x78] sm:$0xff]  }
 0x30e   :  { %v2213_v32 = vpop.permute.xlu1 %2212  ;;  %2236 = vmatprep.subr.bf16.mxu1 %v2219_v16 }
 0x30f   :  { %v2222_v26 = vsel %vm187_vm3, %v2213_v32, %v2215_v33 }
 0x310   :  { %4113 = vmatmul.mubr.msk.bf16.gmra.mrb[12].mxu1 %vm1125_vm9, %v4731_v19 }
 0x311   :  { %4371 = vmatmul.mubr.msk.bf16.vlgmr.msra.gmra.mrb[16].mxu0 %vm1125_vm9, %v4730_v9  ;;  %v4668_v17 = vpop.permute.xlu0 %4667  ;;  %4306 = vmatprep.mubr.msk.bf16.mxu1 %vm1125_vm9, %v4729_v1  ;;  %v4737_v9 = vld [vmem:[#allocation9 + $0x80] sm:$0xff]  }
 0x312   :  { %3526 = vmatpush1.bf16.msra.mxu0 %v3507_v23  ;;  %v4669_v5 = vunpack.i.l.bf16 %v4668_v17  ;;  %v2211_v50 = vpop.permute.xlu1 %2210  ;;  %3557 = vmatprep.mubr.bf16.mxu0 %v4854_v62  ;;  %v4670_v25 = vunpack.i.h.bf16 %v4668_v17  ;;  %v4739_v23 = vld [vmem:[#allocation9 + $0x88] sm:$0xff]  }
 0x313   :  { %3527 = vmatprep.subr.bf16.mxu0 %v3511_v0  ;;  %v2221_v29 = vsel %vm187_vm3, %v2211_v50, %v2213_v32 }
 0x314   :  { %v3509_v3 = vsel %vm2054_vm14, %v3496_v52, %v4669_v5  ;;  %v3512_v28 = vsel %vm2054_vm14, %v3504_v12, %v4670_v25  ;;  %v4740_v25 = vld [vmem:[#allocation9 + $0x80] sm:$0xff]  }
 0x315   :  { %v3656_v21 = vpop.permute.xlu0 %3655 }
 0x316   :  { %3528 = vmatpush1.bf16.msra.mxu0 %v3510_v18  ;;  %v4673_v7 = vpop.permute.xlu1 %4672 }
 0x317   :  { %4374 = vmatprep.subr.bf16.mxu0 %v3509_v3  ;;  %v4674_v37 = vunpack.i.l.bf16 %v4673_v7  ;;  %v4675_v31 = vunpack.i.h.bf16 %v4673_v7 }
 0x318   :  { %4307 = vmatmul.mubr.msk.bf16.vlgmr.msra.gmra.mrb[16].mxu1 %vm1125_vm9, %v4731_v19 }
 0x319   :  { %2237 = vmatpush1.bf16.msra.mxu1 %v2218_v51  ;;  %4166 = vmatmul.mubr.msk.bf16.vlgmr.msra.gmra.mrb[20].mxu0 %vm1125_vm9, %v4732_v22  ;;  %v3654_v4 = vpop.permute.xlu0 %3653  ;;  %v2220_v34 = vsel %vm187_vm3, %v2207_v15, %v4674_v37  ;;  %v2223_v41 = vsel %vm187_vm3, %v2215_v33, %v4675_v31 }
 0x31a   :  { %4375 = vmatpush3.bf16.msra.mxu0 %v3509_v3  ;;  %v3658_v27 = vpop.permute.xlu1 %3657  ;;  %2238 = vmatprep.subr.bf16.mxu1 %v2222_v26  ;;  %v3669_v47 = vsel %vm187_vm3, %v3654_v4, %v3656_v21 }
 0x31b   :  { %4376 = vmatprep.subr.bf16.mxu0 %v3512_v28  ;;  %2268 = vmatprep.mubr.bf16.mxu1 %v4854_v62  ;;  %v3670_v38 = vsel %vm187_vm3, %v3656_v21, %v3658_v27 }
 0x31c   :  { %3567 = vmatprep.mubr.bf16.mxu0 %v4854_v62 }
 0x31d   :  { %2239 = vmatpush1.bf16.msra.mxu1 %v2221_v29  ;;  %v2368_v2 = vpop.permute.xlu0 %2367  ;;  %v4741_v29 = vld [vmem:[#allocation9 + $0x88] sm:$0xff]  }
 0x31e   :  { %4377 = vmatpush3.bf16.msra.mxu0 %v3512_v28  ;;  %v3664_v39 = vpop.permute.xlu1 %3663  ;;  %4310 = vmatprep.subr.bf16.mxu1 %v2220_v34 }
 0x31f   :  { %3687 = vmatprep.subr.bf16.mxu0 %v3670_v38 }
 0x320   :  { %4118 = vmatmul.mubr.msk.bf16.vlgmr.msra.gmra.mrb[8].mxu1 %vm1125_vm9, %v4733_v30 }
 0x321   :  { %4311 = vmatpush3.bf16.msra.mxu1 %v2220_v34  ;;  %4167 = vmatmul.mubr.msk.bf16.gmra.mrb[24].mxu0 %vm1125_vm9, %v4734_v36  ;;  %v3666_v40 = vpop.permute.xlu0 %3665 }
 0x322   :  { %v3662_v42 = vpop.permute.xlu1 %3661  ;;  %4312 = vmatprep.subr.bf16.mxu1 %v2223_v41  ;;  %2278 = vmatprep.mubr.bf16.mxu1 %v4854_v62  ;;  %v3673_v52 = vsel %vm187_vm3, %v3664_v39, %v3666_v40 }
 0x323   :  { %4378 = vmatprep.mubr.msk.bf16.mxu0 %vm1125_vm9, %v4732_v22  ;;  %v3672_v53 = vsel %vm187_vm3, %v3662_v42, %v3664_v39 }
 0x325   :  { %4313 = vmatpush3.bf16.msra.mxu1 %v2223_v41  ;;  %v2366_v44 = vpop.permute.xlu0 %2365 }
 0x326   :  { %v2370_v45 = vpop.permute.xlu1 %2369  ;;  %v2381_v59 = vsel %vm225_vm4, %v2366_v44, %v2368_v2 }
 0x327   :  { %v2382_v46 = vsel %vm225_vm4, %v2368_v2, %v2370_v45 }
 0x328   :  { %2399 = vmatprep.subr.bf16.mxu1 %v2382_v46  ;;  %4119 = vmatmul.mubr.msk.bf16.gmra.mrb[12].mxu1 %vm1125_vm9, %v4735_v43 }
 0x329   :  { %4379 = vmatmul.mubr.msk.bf16.vlgmr.msra.gmra.mrb[16].mxu0 %vm1125_vm9, %v4734_v36  ;;  %v2378_v48 = vpop.permute.xlu0 %2377  ;;  %4314 = vmatprep.mubr.msk.bf16.mxu1 %vm1125_vm9, %v4733_v30  ;;  %v4742_v30 = vld [vmem:[#allocation9 + $0x10] sm:$0xff]  }
 0x32a   :  { %3688 = vmatpush1.bf16.msra.mxu0 %v3669_v47  ;;  %v2376_v49 = vpop.permute.xlu1 %2375  ;;  %3719 = vmatprep.mubr.bf16.mxu0 %v4854_v62 }
 0x32b   :  { %3689 = vmatprep.subr.bf16.mxu0 %v3673_v52  ;;  %v2385_v63 = vsel %vm225_vm4, %v2376_v49, %v2378_v48 }
 0x32d   :  { %v4678_v54 = vpop.permute.xlu0 %4677 }
 0x32e   :  { %3690 = vmatpush1.bf16.msra.mxu0 %v3672_v53  ;;  %v4679_v56 = vunpack.i.l.bf16 %v4678_v54  ;;  %v2374_v57 = vpop.permute.xlu1 %2373  ;;  %v4680_v58 = vunpack.i.h.bf16 %v4678_v54 }
 0x32f   :  { %v2384_v8 = vsel %vm225_vm4, %v2374_v57, %v2376_v49 }
 0x330   :  { %4315 = vmatmul.mubr.msk.bf16.vlgmr.msra.gmra.mrb[16].mxu1 %vm1125_vm9, %v4735_v43  ;;  %v3671_v60 = vsel %vm187_vm3, %v3658_v27, %v4679_v56  ;;  %v3674_v20 = vsel %vm187_vm3, %v3666_v40, %v4680_v58 }
 0x331   :  { %2400 = vmatpush1.bf16.msra.mxu1 %v2381_v59  ;;  %4172 = vmatmul.mubr.msk.bf16.vlgmr.msra.gmra.mrb[20].mxu0 %vm1125_vm9, %v4736_v55  ;;  %v3818_v61 = vpop.permute.xlu0 %3817 }
 0x332   :  { %v4683_v1 = vpop.permute.xlu1 %4682  ;;  %2401 = vmatprep.subr.bf16.mxu1 %v2385_v63  ;;  %4382 = vmatprep.subr.bf16.mxu0 %v3671_v60 }
 0x333   :  { %v4684_v6 = vunpack.i.l.bf16 %v4683_v1  ;;  %4383 = vmatpush3.bf16.msra.mxu0 %v3671_v60  ;;  %2431 = vmatprep.mubr.bf16.mxu1 %v4854_v62  ;;  %v4685_v10 = vunpack.i.h.bf16 %v4683_v1 }
 0x334   :  { %4384 = vmatprep.subr.bf16.mxu0 %v3674_v20  ;;  %3729 = vmatprep.mubr.bf16.mxu0 %v4854_v62 }
 0x335   :  { %2402 = vmatpush1.bf16.msra.mxu1 %v2384_v8  ;;  %v3816_v11 = vpop.permute.xlu0 %3815  ;;  %v2383_v12 = vsel %vm225_vm4, %v2370_v45, %v4684_v6  ;;  %v2386_v16 = vsel %vm225_vm4, %v2378_v48, %v4685_v10 }
 0x336   :  { %v3820_v15 = vpop.permute.xlu1 %3819  ;;  %4318 = vmatprep.subr.bf16.mxu1 %v2383_v12  ;;  %v3831_v0 = vsel %vm225_vm4, %v3816_v11, %v3818_v61 }
 0x337   :  { %4385 = vmatpush3.bf16.msra.mxu0 %v3674_v20  ;;  %v3832_v19 = vsel %vm225_vm4, %v3818_v61, %v3820_v15 }
 0x338   :  { %3849 = vmatprep.subr.bf16.mxu0 %v3832_v19  ;;  %4124 = vmatmul.mubr.msk.bf16.vlgmr.msra.gmra.mrb[8].mxu1 %vm1125_vm9, %v4737_v9 }
 0x339   :  { %4319 = vmatpush3.bf16.msra.mxu1 %v2383_v12  ;;  %4173 = vmatmul.mubr.msk.bf16.gmra.mrb[24].mxu0 %vm1125_vm9, %v4738_v14  ;;  %v3828_v33 = vpop.permute.xlu0 %3827 }
 0x33a   :  { %v3826_v32 = vpop.permute.xlu1 %3825  ;;  %4320 = vmatprep.subr.bf16.mxu1 %v2386_v16  ;;  %2441 = vmatprep.mubr.bf16.mxu1 %v4854_v62 }
 0x33b   :  { %4386 = vmatprep.mubr.msk.bf16.mxu0 %vm1125_vm9, %v4736_v55  ;;  %v3835_v21 = vsel %vm225_vm4, %v3826_v32, %v3828_v33 }
 0x33d   :  { %4321 = vmatpush3.bf16.msra.mxu1 %v2386_v16  ;;  %v2562_v17 = vpop.permute.xlu0 %2561 }
 0x33e   :  { %v3824_v5 = vpop.permute.xlu1 %3823  ;;  %v2576_v50 = vsel %vm1112_vm10, %v2562_v17, %v5294_v13 }
 0x33f   :  { %2593 = vmatprep.subr.bf16.mxu1 %v2576_v50  ;;  %v3834_v22 = vsel %vm225_vm4, %v3824_v5, %v3826_v32 }
 0x340   :  { %4125 = vmatmul.mubr.msk.bf16.gmra.mrb[12].mxu1 %vm1125_vm9, %v4739_v23 }
 0x341   :  { %4387 = vmatmul.mubr.msk.bf16.vlgmr.msra.gmra.mrb[16].mxu0 %vm1125_vm9, %v4738_v14  ;;  %v2570_v3 = vpop.permute.xlu0 %2569  ;;  %4322 = vmatprep.mubr.msk.bf16.mxu1 %vm1125_vm9, %v4737_v9 }
 0x342   :  { %3850 = vmatpush1.bf16.msra.mxu0 %v3831_v0  ;;  %v2560_v18 = vpop.permute.xlu1 %2559  ;;  %3881 = vmatprep.mubr.bf16.mxu0 %v4854_v62  ;;  %v2579_v4 = vsel %vm1112_vm10, %v2570_v3, %v5310_v24 }
 0x343   :  { %3851 = vmatprep.subr.bf16.mxu0 %v3835_v21  ;;  %v2575_v37 = vsel %vm1112_vm10, %v2560_v18, %v2562_v17 }
 0x345   :  { %v3822_v13 = vpop.permute.xlu0 %3821 }
 0x346   :  { %3852 = vmatpush1.bf16.msra.mxu0 %v3834_v22  ;;  %v2568_v7 = vpop.permute.xlu1 %2567  ;;  %v3833_v51 = vsel %vm225_vm4, %v3820_v15, %v3822_v13 }
 0x347   :  { %4390 = vmatprep.subr.bf16.mxu0 %v3833_v51  ;;  %v2578_v28 = vsel %vm1112_vm10, %v2568_v7, %v2570_v3 }
 0x348   :  { %4323 = vmatmul.mubr.msk.bf16.vlgmr.msra.gmra.mrb[16].mxu1 %vm1125_vm9, %v4739_v23 }
 0x349   :  { %2594 = vmatpush1.bf16.msra.mxu1 %v2575_v37  ;;  %4178 = vmatmul.mubr.msk.bf16.vlgmr.msra.gmra.mrb[20].mxu0 %vm1125_vm9, %v4740_v25 }
 0x34a   :  { %4391 = vmatpush3.bf16.msra.mxu0 %v3833_v51  ;;  %v3830_v26 = vpop.permute.xlu1 %3829  ;;  %2595 = vmatprep.subr.bf16.mxu1 %v2579_v4 }
 0x34b   :  { %v3836_v27 = vsel %vm225_vm4, %v3828_v33, %v3830_v26  ;;  %2625 = vmatprep.mubr.bf16.mxu1 %v4854_v62  ;;  %3891 = vmatprep.mubr.bf16.mxu0 %v4854_v62 }
 0x34c   :  { %4392 = vmatprep.subr.bf16.mxu0 %v3836_v27 }
 0x34d   :  { %2596 = vmatpush1.bf16.msra.mxu1 %v2578_v28 }
 0x34e   :  { %4393 = vmatpush3.bf16.msra.mxu0 %v3836_v27 }
 0x350   :  { %4130 = vmatmul.mubr.msk.bf16.vlgmr.msra.gmra.mrb[20].mxu1 %vm1125_vm9, %v4742_v30 }
 0x351   :  { %4179 = vmatmul.mubr.msk.bf16.gmra.mrb[24].mxu0 %vm1125_vm9, %v4741_v29  ;;  %2635 = vmatprep.mubr.bf16.mxu1 %v4854_v62 }
 0x352   :  { %4394 = vmatprep.mubr.msk.bf16.mxu0 %vm1125_vm9, %v4740_v25 }
 0x358   :  { %4131 = vmatmul.mubr.msk.bf16.gmra.mrb[24].mxu1 %vm1125_vm9, %v5330_v35 }
 0x359   :  { %4395 = vmatmul.mubr.msk.bf16.vlgmr.msra.gmra.mrb[16].mxu0 %vm1125_vm9, %v4741_v29 }
 0x40b   :  { %v2433_v24 = vpop.f32.mrb[8].mxu1 }
 0x40c   :  { %2513 = vst [vmem:[#allocation10] sm:$0xff] %v2433_v24  ;;  %v2435_v31 = vpop.f32.mrb[9].mxu1 }
 0x40d   :  { %2514 = vst [vmem:[#allocation10 + $0x8] sm:$0xff] %v2435_v31  ;;  %v2437_v2 = vpop.f32.mrb[10].mxu1 }
 0x40e   :  { %2516 = vst [vmem:[#allocation10 + $0x18] sm:$0xff] %v2437_v2  ;;  %v2439_v34 = vpop.f32.mrb[11].mxu1 }
 0x40f   :  { %2517 = vst [vmem:[#allocation10 + $0x20] sm:$0xff] %v2439_v34 }
 0x413   :  { %v2443_v36 = vpop.f32.mrb[12].mxu1 }
 0x414   :  { %2519 = vst [vmem:[#allocation10 + $0x30] sm:$0xff] %v2443_v36  ;;  %v2445_v39 = vpop.f32.mrb[13].mxu1 }
 0x415   :  { %2520 = vst [vmem:[#allocation10 + $0x38] sm:$0xff] %v2445_v39  ;;  %v2447_v62 = vpop.f32.mrb[14].mxu1 }
 0x416   :  { %2522 = vst [vmem:[#allocation10 + $0x48] sm:$0xff] %v2447_v62  ;;  %v2449_v38 = vpop.f32.mrb[15].mxu1 }
 0x417   :  { %2523 = vst [vmem:[#allocation10 + $0x50] sm:$0xff] %v2449_v38 }
 0x41b   :  { %v4324_v40 = vpop.f32.mrb[16].mxu1 }
 0x41c   :  { %2521 = vst [vmem:[#allocation10 + $0x40] sm:$0xff] %v4324_v40  ;;  %v3883_v35 = vpop.f32.mrb[20].mxu0  ;;  %v2486_v41 = vpop.f32.mrb[17].mxu1 }
 0x41d   :  { %2515 = vst [vmem:[#allocation10 + $0x10] sm:$0xff] %v2486_v41  ;;  %v3885_v42 = vpop.f32.mrb[21].mxu0  ;;  %v4325_v43 = vpop.f32.mrb[18].mxu1 }
 0x41e   :  { %2524 = vst [vmem:[#allocation10 + $0x58] sm:$0xff] %v4325_v43  ;;  %v3887_v44 = vpop.f32.mrb[22].mxu0  ;;  %v2489_v45 = vpop.f32.mrb[19].mxu1 }
 0x41f   :  { %2518 = vst [vmem:[#allocation10 + $0x28] sm:$0xff] %v2489_v45  ;;  %v3889_v46 = vpop.f32.mrb[23].mxu0 }
 0x423   :  { %v2627_v47 = vpop.f32.mrb[20].mxu1 }
 0x424   :  { %v4398_v48 = vadd.f32 %v3883_v35, %v2627_v47  ;;  %v3893_v49 = vpop.f32.mrb[24].mxu0  ;;  %v2629_v52 = vpop.f32.mrb[21].mxu1 }
 0x425   :  { %v4399_v53 = vadd.f32 %v3885_v42, %v2629_v52  ;;  %v3895_v54 = vpop.f32.mrb[25].mxu0  ;;  %v2631_v55 = vpop.f32.mrb[22].mxu1 }
 0x426   :  { %3964 = vst [vmem:[#allocation10 + $0x60] sm:$0xff] %v4398_v48  ;;  %v4400_v56 = vadd.f32 %v3887_v44, %v2631_v55  ;;  %v3897_v57 = vpop.f32.mrb[26].mxu0  ;;  %v2633_v58 = vpop.f32.mrb[23].mxu1 }
 0x427   :  { %3965 = vst [vmem:[#allocation10 + $0x68] sm:$0xff] %v4399_v53  ;;  %v4401_v59 = vadd.f32 %v3889_v46, %v2633_v58  ;;  %v3899_v60 = vpop.f32.mrb[27].mxu0 }
 0x428   :  { %3967 = vst [vmem:[#allocation10 + $0x78] sm:$0xff] %v4400_v56 }
 0x429   :  { %3968 = vst [vmem:[#allocation10 + $0x80] sm:$0xff] %v4401_v59 }
 0x42b   :  { %v2637_v61 = vpop.f32.mrb[24].mxu1 }
 0x42c   :  { %v4402_v63 = vadd.f32 %v3893_v49, %v2637_v61  ;;  %v4396_v1 = vpop.f32.mrb[16].mxu0  ;;  %v2639_v6 = vpop.f32.mrb[25].mxu1 }
 0x42d   :  { %3972 = vst [vmem:[#allocation10 + $0xa0] sm:$0xff] %v4396_v1  ;;  %v4403_v20 = vadd.f32 %v3895_v54, %v2639_v6  ;;  %v3936_v8 = vpop.f32.mrb[17].mxu0  ;;  %v2641_v9 = vpop.f32.mrb[26].mxu1 }
 0x42e   :  { %3970 = vst [vmem:[#allocation10 + $0x90] sm:$0xff] %v4402_v63  ;;  %3966 = vst [vmem:[#allocation10 + $0x70] sm:$0xff] %v3936_v8  ;;  %v4404_v10 = vadd.f32 %v3897_v57, %v2641_v9  ;;  %v4397_v11 = vpop.f32.mrb[18].mxu0  ;;  %v2643_v12 = vpop.f32.mrb[27].mxu1 }
 0x42f   :  { %3971 = vst [vmem:[#allocation10 + $0x98] sm:$0xff] %v4403_v20  ;;  %3975 = vst [vmem:[#allocation10 + $0xb8] sm:$0xff] %v4397_v11  ;;  %v4405_v14 = vadd.f32 %v3899_v60, %v2643_v12  ;;  %v3939_v15 = vpop.f32.mrb[19].mxu0 }
 0x430   :  { %3973 = vst [vmem:[#allocation10 + $0xa8] sm:$0xff] %v4404_v10  ;;  %3969 = vst [vmem:[#allocation10 + $0x88] sm:$0xff] %v3939_v15 }
 0x431   :  { %3974 = vst [vmem:[#allocation10 + $0xb0] sm:$0xff] %v4405_v14 }
 0x432   :  { %4820 = shalt.err (!%p4817_p0)
}
 0x433   :  { %s4821_s20 = scalar_lea.hbm %s5643_s4, 3072 }
 0x434   :  { %p4822_p1 = scmp.ne.s32.totalorder %s5643_s4, %s4821_s20  ;;  %p4825_p2 = scmp.lt.u32.totalorder %s4821_s20, %s5643_s4 }
 0x436   :  { %p4827_p3 = pnand %p4825_p2, %p4822_p1 }
 0x438   :  { %4830 = shalt.err (!%p4827_p3)
}
 0x439   :  { %s4861_s25 = smov 384   ;;  %s4862_s0 = smov 24  }
 0x43a   :  { %3987 = dma.vmem_to_hbm [thread:$0]  %s3982_s16, 3072, %s5643_s4, [#allocation6], %s4861_s25, %s4861_s25, %s4862_s0  }
 0x43b   :  { %4835 = dma.done.wait [#allocation6], 3072  }
 0x43c   :  { %4836 = vsyncadd [#allocation6], 4294964224 }
 0x43d   :  { %3991 = vsyncpa [#allocation5], 1 }
 0x43e   :  { %3992 = vsyncpa [#allocation8], 1 }
 0x43f   :  { %3993 = vsyncpa [#allocation6], 1 }

</bundles_post_ra>
